<compile_context>
chip_gen: v7x
topology: tpu7x:2x2x1
jax: 0.10.0
libtpu: 0.0.40
codegen_flags: <defaults>
</compile_context>

<pallas_src>
import jax
import jax.numpy as jnp
from jax.experimental import pallas as pl
from jax.experimental.pallas import tpu as pltpu

ACCUMULATOR_SIZE = 1024
INPUT_SIZE = 768
OUTPUT_SIZE = 1
NO_BUCKETS = 8


def _round_up(x, m):
    return (x + m - 1) // m * m


def nnue_kernel(stm_ref, nstm_ref, sel_ref,
                w_acc_ref, b_acc_ref, w_heads_ref, b_out_ref,
                out_ref):
    bt = stm_ref.shape[0]

    # Both perspectives in one MXU pass: stack the (already bf16) tiles on M so
    # the 768x1024 resident weight is pushed through the MXU once per step.
    x = jnp.concatenate([stm_ref[...], nstm_ref[...]], axis=0)         # [2*bt, 768] bf16
    v = jnp.dot(x, w_acc_ref[...],
                preferred_element_type=jnp.float32)                    # [2*bt, 1024] f32
    v = v + b_acc_ref[...]                                             # broadcast [1, 1024]

    # ReLU6 in f32 (exact floor semantics; v5e VPU has no bf16 anyway).
    a = jnp.minimum(jnp.maximum(v, 0.0), 6.0)                          # [2*bt, 1024]

    # Fused bucket heads: one resident [1024, 16] weight; cols 0:8 act on the
    # stm half of the stacked activations, cols 8:16 on the nstm half.
    r = jnp.dot(a, w_heads_ref[...],
                preferred_element_type=jnp.float32)                    # [2*bt, 16]
    outs = r[:bt, :NO_BUCKETS] + r[bt:, NO_BUCKETS:] + b_out_ref[...]  # [bt, 8]

    # gather(dim=1, index=selectors) via one-hot select (no dynamic gather on
    # TPU).  Done in the transposed [8, bt] orientation so the store is a
    # lane-dense [1, bt] row (unmasked vst); the tiny transpose is XLU work.
    outs_t = outs.T                                                    # [8, bt]
    sel = sel_ref[...]                                                 # [1, bt] int32
    bucket_ids = jax.lax.broadcasted_iota(jnp.int32, outs_t.shape, 0)  # [8, bt]
    selected = jnp.sum(jnp.where(bucket_ids == sel, outs_t, 0.0),
                       axis=0, keepdims=True)                          # [1, bt]

    # torch float `//` == floor division.
    out_ref[...] = jnp.floor(selected / (100.0 * 100.0))


def prep_params(params):
    """One-time parameter preprocessing, hoisted out of the forward path."""
    # Accumulator weight: [1024, 768] -> [768, 1024], bf16 for the MXU.
    w_acc_t = jnp.asarray(params["w_acc"]).T.astype(jnp.bfloat16)            # [768, 1024]
    b_acc = jnp.asarray(params["b_acc"]).reshape(1, ACCUMULATOR_SIZE).astype(jnp.float32)
    # Heads: stacked [8, 1, 2048] -> [2048, 8] -> fused [1024, 16]
    # (cols 0:8 = top/stm half, cols 8:16 = bottom/nstm half).  Kept f32 (tiny).
    w_out = jnp.transpose(
        jnp.asarray(params["w_out"]).reshape(NO_BUCKETS, 2 * ACCUMULATOR_SIZE)
    ).astype(jnp.float32)                                                    # [2048, 8]
    w_heads = jnp.concatenate([w_out[:ACCUMULATOR_SIZE, :],
                               w_out[ACCUMULATOR_SIZE:, :]], axis=1)         # [1024, 16]
    b_out = jnp.asarray(params["b_out"]).reshape(1, NO_BUCKETS).astype(jnp.float32)
    return {"w_acc_t": w_acc_t, "b_acc": b_acc, "w_heads": w_heads, "b_out": b_out}


def nnue_forward(stm, nstm, selectors, prepped, *, block_batch=512):
    """stm/nstm: [B, 768] 0/1 features (ideally already bf16), selectors: [B, 1] int.

    Returns [B, 1] f32.  block_batch must be a multiple of 128; keep
    B >= 2*block_batch on v7x so both TensorCores get grid steps.
    """
    assert block_batch % 128 == 0
    B = stm.shape[0]

    # Features are exact 0/1 -> ship as bf16 (no-op if the caller already does).
    if stm.dtype != jnp.bfloat16:
        stm = stm.astype(jnp.bfloat16)
    if nstm.dtype != jnp.bfloat16:
        nstm = nstm.astype(jnp.bfloat16)

    # Only pad the row count up to the 8-sublane granule (<= 7 rows).  The
    # batch grid uses cdiv + a partial final block, so B % block_batch != 0
    # does NOT re-materialize the inputs in HBM.
    b8 = _round_up(max(B, 1), 8)
    if b8 != B:
        pad = b8 - B
        stm = jnp.pad(stm, ((0, pad), (0, 0)))
        nstm = jnp.pad(nstm, ((0, pad), (0, 0)))

    bt = min(block_batch, b8)
    num_tiles = pl.cdiv(b8, bt)
    b_lanes = num_tiles * bt

    # Selectors / output travel lane-dense as [1, b_lanes]; padding them costs
    # a few bytes (garbage tail lanes are sliced off below).
    sel = selectors.reshape(-1).astype(jnp.int32)
    if b_lanes != B:
        sel = jnp.pad(sel, (0, b_lanes - B))
    sel = sel.reshape(1, b_lanes)

    tile_rows = lambda i: (i, 0)     # batch-tiled along sublanes (features)
    tile_lanes = lambda i: (0, i)    # batch-tiled along lanes (selectors/out)
    const_map = lambda i: (0, 0)     # VMEM-resident weights / biases

    flops = (2 * (2 * b8) * INPUT_SIZE * ACCUMULATOR_SIZE
             + 2 * (2 * b8) * ACCUMULATOR_SIZE * 2 * NO_BUCKETS)
    bytes_accessed = (2 * b8 * INPUT_SIZE * 2               # stm + nstm (bf16)
                      + b_lanes * 4 + b_lanes * 4           # selectors + output
                      + INPUT_SIZE * ACCUMULATOR_SIZE * 2   # bf16 accumulator weight
                      + ACCUMULATOR_SIZE * 4                # b_acc
                      + ACCUMULATOR_SIZE * 2 * NO_BUCKETS * 4   # fused head weight
                      + NO_BUCKETS * 4)

    # VMEM ask sized for the chosen tile (double-buffered bf16 input tiles,
    # resident weights, f32 activation temps) with 2x headroom; capped under
    # v7x's 64 MiB physical VMEM.
    est = (2 * 2 * bt * INPUT_SIZE * 2                       # stm/nstm tiles, dbuf, bf16
           + 2 * INPUT_SIZE * ACCUMULATOR_SIZE * 2           # resident w_acc (x2 bufs)
           + 2 * bt * INPUT_SIZE * 2                         # stacked bf16 LHS temp
           + 2 * 2 * bt * ACCUMULATOR_SIZE * 4               # pre/post-activation f32
           + 2 * ACCUMULATOR_SIZE * 2 * NO_BUCKETS * 4)      # head weight bufs
    vmem_limit = int(min(60 * 1024 * 1024, max(24 * 1024 * 1024, 2 * est)))

    out = pl.pallas_call(
        nnue_kernel,
        out_shape=jax.ShapeDtypeStruct((1, b_lanes), jnp.float32),
        grid=(num_tiles,),
        in_specs=[
            pl.BlockSpec((bt, INPUT_SIZE), tile_rows),                    # stm   (bf16)
            pl.BlockSpec((bt, INPUT_SIZE), tile_rows),                    # nstm  (bf16)
            pl.BlockSpec((1, bt), tile_lanes),                            # selectors
            pl.BlockSpec((INPUT_SIZE, ACCUMULATOR_SIZE), const_map),      # w_acc_t (bf16)
            pl.BlockSpec((1, ACCUMULATOR_SIZE), const_map),               # b_acc
            pl.BlockSpec((ACCUMULATOR_SIZE, 2 * NO_BUCKETS), const_map),  # w_heads
            pl.BlockSpec((1, NO_BUCKETS), const_map),                     # b_out
        ],
        out_specs=pl.BlockSpec((1, bt), tile_lanes),
        compiler_params=pltpu.CompilerParams(
            dimension_semantics=("parallel",),
            vmem_limit_bytes=vmem_limit),
        cost_estimate=pl.CostEstimate(flops=flops, transcendentals=0,
                                      bytes_accessed=bytes_accessed),
    )(stm, nstm, sel,
      prepped["w_acc_t"], prepped["b_acc"], prepped["w_heads"], prepped["b_out"])

    return out[0, :B].reshape(B, OUTPUT_SIZE)


def nnue_reference(stm, nstm, selectors, params):
    """Pure-JAX reference mirroring the PyTorch code.

    The accumulator weight is rounded to bf16 exactly as the kernel stores it
    (inputs are exact 0/1 in bf16 already).  Returns (floored output,
    pre-floor selected value) so callers can treat floor-boundary rows
    explicitly instead of relying on exact equality of a floored quantity.
    """
    w_acc = params["w_acc"].astype(jnp.bfloat16).astype(jnp.float32)
    stm = stm.astype(jnp.float32)
    nstm = nstm.astype(jnp.float32)
    stm_v = stm @ w_acc.T + params["b_acc"]
    nstm_v = nstm @ w_acc.T + params["b_acc"]
    combined = jnp.clip(jnp.concatenate([stm_v, nstm_v], axis=1), 0.0, 6.0)
    w = params["w_out"].reshape(NO_BUCKETS, 2 * ACCUMULATOR_SIZE)
    outputs = combined @ w.T + params["b_out"].reshape(NO_BUCKETS)   # [B, 8]
    pre = jnp.take_along_axis(outputs, selectors.astype(jnp.int32), axis=1)
    # TODO(synk): the in-forward `print(selected_output)` debug print is omitted.
    return jnp.floor(pre / (100.0 * 100.0)), pre


def _check(out, ref_floor, ref_pre, boundary_eps=1e-3):
    # floor(x/1e4) is ULP-sensitive exactly at multiples of 1e4 (here: near 0).
    # Accept a floored mismatch only where the reference sits on such a boundary.
    dist = jnp.abs(ref_pre - jnp.round(ref_pre / 10000.0) * 10000.0)
    ok = (out == ref_floor) | (dist < boundary_eps)
    assert bool(jnp.all(ok)), (out, ref_floor, ref_pre)


def init_params(key):
    k1, k2, k3, k4 = jax.random.split(key, 4)
    # Deterministic synthetic init (PyTorch-like uniform fan-in scaling).
    lim_acc = 1.0 / jnp.sqrt(INPUT_SIZE)
    lim_out = 1.0 / jnp.sqrt(2 * ACCUMULATOR_SIZE)
    return {
        "w_acc": jax.random.uniform(k1, (ACCUMULATOR_SIZE, INPUT_SIZE),
                                    jnp.float32, -lim_acc, lim_acc),
        "b_acc": jax.random.uniform(k2, (ACCUMULATOR_SIZE,),
                                    jnp.float32, -lim_acc, lim_acc),
        "w_out": jax.random.uniform(k3, (NO_BUCKETS, OUTPUT_SIZE, 2 * ACCUMULATOR_SIZE),
                                    jnp.float32, -lim_out, lim_out),
        "b_out": jax.random.uniform(k4, (NO_BUCKETS, OUTPUT_SIZE),
                                    jnp.float32, -lim_out, lim_out),
    }


def _make_inputs(key, batch):
    ks, kn, kc = jax.random.split(key, 3)
    # Sparse 0/1 board-feature inputs, produced directly in bf16 (exact values,
    # half the HBM bytes of f32) as the kernel expects.
    stm = (jax.random.uniform(ks, (batch, INPUT_SIZE)) < 0.05).astype(jnp.bfloat16)
    nstm = (jax.random.uniform(kn, (batch, INPUT_SIZE)) < 0.05).astype(jnp.bfloat16)
    selectors = jax.random.randint(kc, (batch, 1), 0, NO_BUCKETS, dtype=jnp.int32)
    return stm, nstm, selectors


if __name__ == "__main__":
    key = jax.random.PRNGKey(0)
    kp, k_small, k_big = jax.random.split(key, 3)

    params = init_params(kp)
    prepped = prep_params(params)   # one-time weight prep, hoisted out of forward

    # Small single-tile case (B=4 -> one 8-row tile).
    B = 4
    stm, nstm, selectors = _make_inputs(k_small, B)
    out = nnue_forward(stm, nstm, selectors, prepped)
    jax.block_until_ready(out)
    assert out.shape == (B, OUTPUT_SIZE)
    ref_f, ref_p = nnue_reference(stm, nstm, selectors, params)
    _check(out, ref_f, ref_p)

    # Multi-tile grid with a partial final block (272 = 2*128 + 16): exercises
    # the cdiv grid (no input re-padding) and lane-dense selector/output tiling.
    B2 = 272
    stm2, nstm2, selectors2 = _make_inputs(k_big, B2)
    out2 = nnue_forward(stm2, nstm2, selectors2, prepped, block_batch=128)
    jax.block_until_ready(out2)
    assert out2.shape == (B2, OUTPUT_SIZE)
    ref_f2, ref_p2 = nnue_reference(stm2, nstm2, selectors2, params)
    _check(out2, ref_f2, ref_p2)

    print("KERNEL_OK")
</pallas_src>

<mosaic_0001>
module attributes {stable_mosaic.version = 11 : i64} {
  func.func @nnue_kernel(%arg0: i32, %arg1: memref<8x768xbf16, #tpu.memory_space<vmem>>, %arg2: memref<8x768xbf16, #tpu.memory_space<vmem>>, %arg3: memref<1x8xi32, #tpu.memory_space<vmem>>, %arg4: memref<768x1024xbf16, #tpu.memory_space<vmem>>, %arg5: memref<1x1024xf32, #tpu.memory_space<vmem>>, %arg6: memref<1024x16xf32, #tpu.memory_space<vmem>>, %arg7: memref<1x8xf32, #tpu.memory_space<vmem>>, %arg8: memref<1x8xf32, #tpu.memory_space<vmem>>) attributes {dimension_semantics = [#tpu.dimension_semantics<parallel>], iteration_bounds = array<i64: 1>, scalar_prefetch = 0 : i64, scratch_operands = 0 : i64, tpu.core_type = #tpu.core_type<tc>, window_params = [{transform_indices = @transform_0, window_bounds = array<i64: 8, 768>}, {transform_indices = @transform_1, window_bounds = array<i64: 8, 768>}, {transform_indices = @transform_2, window_bounds = array<i64: 1, 8>}, {pipeline_mode = #tpu.pipeline_mode<synchronous>, transform_indices = @transform_3, window_bounds = array<i64: 768, 1024>}, {pipeline_mode = #tpu.pipeline_mode<synchronous>, transform_indices = @transform_4, window_bounds = array<i64: 1, 1024>}, {pipeline_mode = #tpu.pipeline_mode<synchronous>, transform_indices = @transform_5, window_bounds = array<i64: 1024, 16>}, {pipeline_mode = #tpu.pipeline_mode<synchronous>, transform_indices = @transform_6, window_bounds = array<i64: 1, 8>}, {transform_indices = @transform_7, window_bounds = array<i64: 1, 8>}]} {
    %c0 = arith.constant 0 : index
    %c0_0 = arith.constant 0 : index
    %0 = vector.load %arg1[%c0, %c0_0] : memref<8x768xbf16, #tpu.memory_space<vmem>>, vector<8x768xbf16>
    %c0_1 = arith.constant 0 : index
    %c0_2 = arith.constant 0 : index
    %1 = vector.load %arg2[%c0_1, %c0_2] : memref<8x768xbf16, #tpu.memory_space<vmem>>, vector<8x768xbf16>
    %2 = tpu.concatenate %0, %1 in 0 : vector<8x768xbf16>, vector<8x768xbf16> -> vector<16x768xbf16>
    %c0_3 = arith.constant 0 : index
    %c0_4 = arith.constant 0 : index
    %3 = vector.load %arg4[%c0_3, %c0_4] : memref<768x1024xbf16, #tpu.memory_space<vmem>>, vector<768x1024xbf16>
    %cst = arith.constant dense<0.000000e+00> : vector<16x1024xf32>
    %4 = tpu.matmul %2, %3, %cst {dimension_numbers = #tpu.dot_dimension_numbers<[1], [0], [0], [1], [0, 0, 1, 1], [], []>} : vector<16x768xbf16>, vector<768x1024xbf16>, vector<16x1024xf32> -> vector<16x1024xf32>
    %c0_5 = arith.constant 0 : index
    %c0_6 = arith.constant 0 : index
    %5 = vector.load %arg5[%c0_5, %c0_6] : memref<1x1024xf32, #tpu.memory_space<vmem>>, vector<1x1024xf32>
    %6 = vector.broadcast %5 : vector<1x1024xf32> to vector<16x1024xf32>
    %7 = arith.addf %4, %6 : vector<16x1024xf32>
    %cst_7 = arith.constant 0.000000e+00 : f32
    %8 = vector.broadcast %cst_7 : f32 to vector<16x1024xf32>
    %9 = arith.maximumf %7, %8 : vector<16x1024xf32>
    %cst_8 = arith.constant 6.000000e+00 : f32
    %10 = vector.broadcast %cst_8 : f32 to vector<16x1024xf32>
    %11 = arith.minimumf %9, %10 : vector<16x1024xf32>
    %c0_9 = arith.constant 0 : index
    %c0_10 = arith.constant 0 : index
    %12 = vector.load %arg6[%c0_9, %c0_10] : memref<1024x16xf32, #tpu.memory_space<vmem>>, vector<1024x16xf32>
    %cst_11 = arith.constant dense<0.000000e+00> : vector<16x16xf32>
    %13 = tpu.matmul %11, %12, %cst_11 {dimension_numbers = #tpu.dot_dimension_numbers<[1], [0], [0], [1], [0, 0, 1, 1], [], []>} : vector<16x1024xf32>, vector<1024x16xf32>, vector<16x16xf32> -> vector<16x16xf32>
    %14 = vector.extract_strided_slice %13 {offsets = [0, 0], sizes = [8, 8], strides = [1, 1]} : vector<16x16xf32> to vector<8x8xf32>
    %15 = vector.extract_strided_slice %13 {offsets = [8, 8], sizes = [8, 8], strides = [1, 1]} : vector<16x16xf32> to vector<8x8xf32>
    %16 = arith.addf %14, %15 : vector<8x8xf32>
    %c0_12 = arith.constant 0 : index
    %c0_13 = arith.constant 0 : index
    %17 = vector.load %arg7[%c0_12, %c0_13] : memref<1x8xf32, #tpu.memory_space<vmem>>, vector<1x8xf32>
    %18 = vector.broadcast %17 : vector<1x8xf32> to vector<8x8xf32>
    %19 = arith.addf %16, %18 : vector<8x8xf32>
    %20 = tpu.transpose %19, [1, 0] : vector<8x8xf32> -> vector<8x8xf32>
    %c0_14 = arith.constant 0 : index
    %c0_15 = arith.constant 0 : index
    %21 = vector.load %arg3[%c0_14, %c0_15] : memref<1x8xi32, #tpu.memory_space<vmem>>, vector<1x8xi32>
    %22 = tpu.iota {dimensions = array<i32: 0>} : vector<8x8xi32>
    %23 = vector.broadcast %21 : vector<1x8xi32> to vector<8x8xi32>
    %24 = arith.cmpi eq, %22, %23 : vector<8x8xi32>
    %cst_16 = arith.constant 0.000000e+00 : f32
    %25 = vector.broadcast %cst_16 : f32 to vector<8x8xf32>
    %26 = arith.select %24, %20, %25 : vector<8x8xi1>, vector<8x8xf32>
    %cst_17 = arith.constant dense<0.000000e+00> : vector<8xf32>
    %27 = vector.multi_reduction <add>, %26, %cst_17 [0] : vector<8x8xf32> to vector<8xf32>
    %28 = vector.shape_cast %27 : vector<8xf32> to vector<1x8xf32>
    %cst_18 = arith.constant 1.000000e+04 : f32
    %29 = vector.broadcast %cst_18 : f32 to vector<1x8xf32>
    %30 = arith.divf %28, %29 : vector<1x8xf32>
    %31 = math.floor %30 : vector<1x8xf32>
    %c0_19 = arith.constant 0 : index
    %c0_20 = arith.constant 0 : index
    %32 = vector.load %arg8[%c0_19, %c0_20] : memref<1x8xf32, #tpu.memory_space<vmem>>, vector<1x8xf32>
    tpu.vector_store %arg8[%c0_19, %c0_20], %31 {strides = array<i32>} : memref<1x8xf32, #tpu.memory_space<vmem>>, vector<1x8xf32>,
    return
  }
  func.func @transform_0(%arg0: i32) -> (i32, i32) {
    %c0_i32 = arith.constant 0 : i32
    %c0_i32_0 = arith.constant 0 : i32
    return %arg0, %c0_i32 : i32, i32
  }
  func.func @transform_1(%arg0: i32) -> (i32, i32) {
    %c0_i32 = arith.constant 0 : i32
    %c0_i32_0 = arith.constant 0 : i32
    return %arg0, %c0_i32 : i32, i32
  }
  func.func @transform_2(%arg0: i32) -> (i32, i32) {
    %c0_i32 = arith.constant 0 : i32
    %c0_i32_0 = arith.constant 0 : i32
    return %c0_i32, %arg0 : i32, i32
  }
  func.func @transform_3(%arg0: i32) -> (i32, i32) {
    %c0_i32 = arith.constant 0 : i32
    %c0_i32_0 = arith.constant 0 : i32
    %c0_i32_1 = arith.constant 0 : i32
    return %c0_i32, %c0_i32_0 : i32, i32
  }
  func.func @transform_4(%arg0: i32) -> (i32, i32) {
    %c0_i32 = arith.constant 0 : i32
    %c0_i32_0 = arith.constant 0 : i32
    %c0_i32_1 = arith.constant 0 : i32
    return %c0_i32, %c0_i32_0 : i32, i32
  }
  func.func @transform_5(%arg0: i32) -> (i32, i32) {
    %c0_i32 = arith.constant 0 : i32
    %c0_i32_0 = arith.constant 0 : i32
    %c0_i32_1 = arith.constant 0 : i32
    return %c0_i32, %c0_i32_0 : i32, i32
  }
  func.func @transform_6(%arg0: i32) -> (i32, i32) {
    %c0_i32 = arith.constant 0 : i32
    %c0_i32_0 = arith.constant 0 : i32
    %c0_i32_1 = arith.constant 0 : i32
    return %c0_i32, %c0_i32_0 : i32, i32
  }
  func.func @transform_7(%arg0: i32) -> (i32, i32) {
    %c0_i32 = arith.constant 0 : i32
    %c0_i32_0 = arith.constant 0 : i32
    return %c0_i32, %arg0 : i32, i32
  }
}

</mosaic_0001>

<bundles_post_ra>
// kernel: tpu_custom_call.1
= control target key start
LH: loop header
LB: loop body
LE: loop exit
PB: predicated region body
PF: predicated region fallthrough
CT: control target
= control target key end

     0   :  { %12 = vsyncpa [#allocation3], 0  ;;  %s5104_s0 = inlined_call_operand.hbm [shape: bf16[8,768], index: 0, kind: input, shape index: {}]   ;;  %s5105_s1 = inlined_call_operand.hbm [shape: bf16[8,768], index: 1, kind: input, shape index: {}]   ;;  %s5106_s2 = inlined_call_operand.hbm [shape: s32[1,8], index: 2, kind: input, shape index: {}]   ;;  %s5107_s3 = inlined_call_operand.hbm [shape: bf16[768,1024], index: 3, kind: input, shape index: {}]   ;;  %s5108_s4 = inlined_call_operand.hbm [shape: f32[1,1024], index: 4, kind: input, shape index: {}]   ;;  %s5109_s5 = inlined_call_operand.vmem [shape: f32[1024,16], index: 5, kind: input, shape index: {}]   ;;  %s5110_s6 = inlined_call_operand.hbm [shape: f32[1,8], index: 6, kind: input, shape index: {}]   ;;  %s5111_s7 = inlined_call_operand.hbm [shape: f32[1,8], index: 7, kind: output, shape index: {}]  }
   0x1   :  { %13 = vsyncpa [#allocation6], 0 }
   0x2   :  { %14 = vsyncpa [#allocation9], 0 }
   0x3   :  { %15 = vsyncpa [#allocation12], 0 }
   0x4   :  { %16 = vsyncpa [#allocation4], 0  ;;  %s4480_s24 = smov [#allocation5]   ;;  %s4481_s26 = smov [#allocation8]  }
   0x5   :  { %s33_s25 = sshll.u32 %s4480_s24, 4  ;;  %s52_s27 = sshll.u32 %s4481_s26, 4  ;;  %s34_s25 = int_to_ptr.vmem [resolvable:$true] %s33_s25  ;;  %s4530_s27 = int_to_ptr.vmem [resolvable:$true] %s52_s27 }
   0x6   :  { %s4316_s30 = scalar_lea.hbm %s5105_s1, 384 }
   0x7   :  { %p4317_p0 = scmp.ne.s32.totalorder %s5105_s1, %s4316_s30  ;;  %p4320_p1 = scmp.lt.u32.totalorder %s4316_s30, %s5105_s1 }
   0x9   :  { %p4322_p2 = pnand %p4320_p1, %p4317_p0 }
   0xb   :  { %4325 = shalt.err (!%p4322_p2)
}
   0xc   :  { %s4326_s12 = scalar_lea.vmem %s34_s25, 384  ;;  %p4331_p4 = scmp.lt.s32.totalorder %s34_s25, %s34_s25 }
   0xd   :  { %p4327_p3 = scmp.ne.s32.totalorder %s34_s25, %s4326_s12  ;;  %p4332_p5 = scmp.lt.s32.totalorder %s4326_s12, %s4326_s12 }
   0xf   :  { %p4333_p6 = por %p4332_p5, %p4331_p4 }
  0x11   :  { %p4334_p7 = pnand %p4333_p6, %p4327_p3 }
  0x13   :  { %4337 = shalt.err (!%p4334_p7)
}
  0x14   :  { %36 = dma.hbm_to_vmem [thread:$0]  %s5105_s1, 384, %s34_s25, [#allocation6]  }
  0x15   :  { %s4338_s17 = scalar_lea.hbm %s5107_s3, 49152 }
  0x16   :  { %p4339_p8 = scmp.ne.s32.totalorder %s5107_s3, %s4338_s17  ;;  %p4342_p9 = scmp.lt.u32.totalorder %s4338_s17, %s5107_s3 }
  0x18   :  { %p4344_p10 = pnand %p4342_p9, %p4339_p8 }
  0x1a   :  { %4347 = shalt.err (!%p4344_p10)
}
  0x1b   :  { %s4348_s22 = scalar_lea.vmem %s4530_s27, 49152  ;;  %p4353_p12 = scmp.lt.s32.totalorder %s4530_s27, %s4530_s27 }
  0x1c   :  { %p4349_p11 = scmp.ne.s32.totalorder %s4530_s27, %s4348_s22  ;;  %p4354_p13 = scmp.lt.s32.totalorder %s4348_s22, %s4348_s22 }
  0x1e   :  { %p4355_p0 = por %p4354_p13, %p4353_p12 }
  0x20   :  { %p4356_p1 = pnand %p4355_p0, %p4349_p11 }
  0x22   :  { %4359 = shalt.err (!%p4356_p1)
}
  0x23   :  { %s4482_s1 = smov 512   ;;  %s4483_s23 = smov 32  }
  0x24   :  { %58 = dma.hbm_to_vmem [thread:$0]  %s5107_s3, 49152, %s4530_s27, [#allocation9], %s4482_s1, %s4482_s1, %s4483_s23  }
  0x25   :  { %s4484_s26 = smov [#allocation2]   ;;  %s4485_s29 = smov [#allocation7]  }
  0x26   :  { %s23_s28 = sshll.u32 %s4484_s26, 4  ;;  %s43_s30 = sshll.u32 %s4485_s29, 4  ;;  %s24_s28 = int_to_ptr.vmem [resolvable:$true] %s23_s28  ;;  %s44_s30 = int_to_ptr.vmem [resolvable:$true] %s43_s30 }
  0x27   :  { %s4360_s10 = scalar_lea.hbm %s5104_s0, 384 }
  0x28   :  { %p4361_p2 = scmp.ne.s32.totalorder %s5104_s0, %s4360_s10  ;;  %p4364_p3 = scmp.lt.u32.totalorder %s4360_s10, %s5104_s0 }
  0x2a   :  { %p4366_p4 = pnand %p4364_p3, %p4361_p2 }
  0x2c   :  { %4369 = shalt.err (!%p4366_p4)
}
  0x2d   :  { %s4370_s3 = scalar_lea.vmem %s24_s28, 384  ;;  %p4375_p6 = scmp.lt.s32.totalorder %s24_s28, %s24_s28 }
  0x2e   :  { %p4371_p5 = scmp.ne.s32.totalorder %s24_s28, %s4370_s3  ;;  %p4376_p7 = scmp.lt.s32.totalorder %s4370_s3, %s4370_s3 }
  0x30   :  { %p4377_p8 = por %p4376_p7, %p4375_p6 }
  0x32   :  { %p4378_p9 = pnand %p4377_p8, %p4371_p5 }
  0x34   :  { %4381 = shalt.err (!%p4378_p9)
}
  0x35   :  { %26 = dma.hbm_to_vmem [thread:$0]  %s5104_s0, 384, %s24_s28, [#allocation3]  }
  0x36   :  { %s4382_s18 = scalar_lea.hbm %s5106_s2, 16 }
  0x37   :  { %p4383_p10 = scmp.ne.s32.totalorder %s5106_s2, %s4382_s18  ;;  %p4386_p11 = scmp.lt.u32.totalorder %s4382_s18, %s5106_s2 }
  0x39   :  { %p4388_p12 = pnand %p4386_p11, %p4383_p10 }
  0x3b   :  { %4391 = shalt.err (!%p4388_p12)
}
  0x3c   :  { %s4392_s1 = scalar_lea.vmem %s44_s30, 16  ;;  %s4396_s23 = scalar_lea.vmem %s44_s30, 32 }
  0x3d   :  { %p4393_p13 = scmp.ne.s32.totalorder %s44_s30, %s4392_s1  ;;  %p4397_p0 = scmp.lt.s32.totalorder %s44_s30, %s44_s30 }
  0x3e   :  { %p4398_p1 = scmp.lt.s32.totalorder %s4396_s23, %s4392_s1 }
  0x40   :  { %p4399_p2 = por %p4398_p1, %p4397_p0 }
  0x42   :  { %p4400_p3 = pnand %p4399_p2, %p4393_p13 }
  0x44   :  { %4403 = shalt.err (!%p4400_p3)
}
  0x45   :  { %46 = dma.hbm_to_vmem [thread:$0]  %s5106_s2, 16, %s44_s30, [#allocation6]  }
  0x46   :  { %s4486_s25 = smov [#allocation10]   ;;  %s4487_s28 = smov [#allocation11]  }
  0x47   :  { %s65_s26 = sshll.u32 %s4486_s25, 4  ;;  %s77_s29 = sshll.u32 %s4487_s28, 4  ;;  %s66_s26 = int_to_ptr.vmem [resolvable:$true] %s65_s26  ;;  %s78_s29 = int_to_ptr.vmem [resolvable:$true] %s77_s29 }
  0x48   :  { %s4404_s10 = scalar_lea.hbm %s5108_s4, 128 }
  0x49   :  { %p4405_p4 = scmp.ne.s32.totalorder %s5108_s4, %s4404_s10  ;;  %p4408_p5 = scmp.lt.u32.totalorder %s4404_s10, %s5108_s4 }
  0x4b   :  { %p4410_p6 = pnand %p4408_p5, %p4405_p4 }
  0x4d   :  { %4413 = shalt.err (!%p4410_p6)
}
  0x4e   :  { %s4414_s2 = scalar_lea.vmem %s66_s26, 128  ;;  %p4419_p8 = scmp.lt.s32.totalorder %s66_s26, %s66_s26 }
  0x4f   :  { %p4415_p7 = scmp.ne.s32.totalorder %s66_s26, %s4414_s2  ;;  %p4420_p9 = scmp.lt.s32.totalorder %s4414_s2, %s4414_s2 }
  0x51   :  { %p4421_p10 = por %p4420_p9, %p4419_p8 }
  0x53   :  { %p4422_p11 = pnand %p4421_p10, %p4415_p7 }
  0x55   :  { %4425 = shalt.err (!%p4422_p11)
}
  0x56   :  { %68 = dma.hbm_to_vmem [thread:$0]  %s5108_s4, 128, %s66_s26, [#allocation9]  }
  0x57   :  { %s4426_s16 = scalar_lea.hbm %s5110_s6, 16 }
  0x58   :  { %p4427_p12 = scmp.ne.s32.totalorder %s5110_s6, %s4426_s16  ;;  %p4430_p13 = scmp.lt.u32.totalorder %s4426_s16, %s5110_s6 }
  0x5a   :  { %p4432_p0 = pnand %p4430_p13, %p4427_p12 }
  0x5c   :  { %4435 = shalt.err (!%p4432_p0)
}
  0x5d   :  { %s4436_s21 = scalar_lea.vmem %s78_s29, 16  ;;  %s4440_s22 = scalar_lea.vmem %s78_s29, 32 }
  0x5e   :  { %p4437_p1 = scmp.ne.s32.totalorder %s78_s29, %s4436_s21  ;;  %p4441_p2 = scmp.lt.s32.totalorder %s78_s29, %s78_s29 }
  0x5f   :  { %p4442_p3 = scmp.lt.s32.totalorder %s4440_s22, %s4436_s21 }
  0x61   :  { %p4443_p4 = por %p4442_p3, %p4441_p2 }
  0x63   :  { %p4444_p5 = pnand %p4443_p4, %p4437_p1 }
  0x65   :  { %4447 = shalt.err (!%p4444_p5)
}
  0x66   :  { %80 = dma.hbm_to_vmem [thread:$0]  %s5110_s6, 16, %s78_s29, [#allocation12]  }
  0x67   :  { %4470 = dma.done.wait [#allocation3], 384  }
  0x68   :  { %4471 = vsyncadd [#allocation3], 4294966912 }
  0x69   :  { %4472 = dma.done.wait [#allocation6], 400  }
  0x6a   :  { %4473 = vsyncadd [#allocation6], 4294966896 }
  0x6b   :  { %4474 = dma.done.wait [#allocation9], 49280  }
  0x6c   :  { %4475 = vsyncadd [#allocation9], 4294918016 }
  0x6d   :  { %4476 = dma.done.wait [#allocation12], 16  }
  0x6e   :  { %4477 = vsyncadd [#allocation12], 4294967280  ;;  %v160_v0 = vld [vmem:[#allocation8] sm:$0xff]  ;;  %v161_v2 = vld [vmem:[#allocation8 + $0x8] sm:$0xff]  ;;  %vm135_vm0 = vcmask 1043456   ;;  %vm3536_vm2 = vcmask 64512  }
  0x6f   :  { %v164_v1 = vld [vmem:[#allocation8 + $0x20] sm:$0xff]  ;;  %v165_v4 = vld [vmem:[#allocation8 + $0x28] sm:$0xff]  ;;  %s4489_s20 = smov [#allocation13]   ;;  %vm3547_vm3 = vcmask 57344  }
  0x70   :  { %v3580_v3 = vcombine.high %v160_v0, %v164_v1  ;;  %v3579_v5 = vcombine.low %v160_v0, %v164_v1  ;;  %v168_v6 = vld [vmem:[#allocation8 + $0x40] sm:$0xff]  ;;  %v3582_v8 = vcombine.high %v161_v2, %v165_v4  ;;  %v3581_v9 = vcombine.low %v161_v2, %v165_v4  ;;  %v169_v11 = vld [vmem:[#allocation8 + $0x48] sm:$0xff]  ;;  %s3555_s21 = sshll.u32 %s4489_s20, 4  ;;  %s3556_s21 = int_to_ptr.vmem [resolvable:$true] %s3555_s21 }
  0x71   :  { %v172_v7 = vld [vmem:[#allocation8 + $0x60] sm:$0xff]  ;;  %v173_v12 = vld [vmem:[#allocation8 + $0x68] sm:$0xff]  ;;  %s4448_s22 = scalar_lea.vmem %s3556_s21, 16  ;;  %s4452_s4 = scalar_lea.vmem %s3556_s21, 32 }
  0x72   :  { %v3588_v10 = vcombine.high %v168_v6, %v172_v7  ;;  %v176_v13 = vld [vmem:[#allocation8 + $0x80] sm:$0xff]  ;;  %2506 = vmatprep.subr.bf16.mxu0 %v3580_v3  ;;  %v3590_v14 = vcombine.high %v169_v11, %v173_v12  ;;  %v177_v16 = vld [vmem:[#allocation8 + $0x88] sm:$0xff]  ;;  %2635 = vmatprep.subr.bf16.mxu1 %v3582_v8  ;;  %v3587_v18 = vcombine.low %v168_v6, %v172_v7  ;;  %p4449_p6 = scmp.ne.s32.totalorder %s3556_s21, %s4448_s22  ;;  %p4453_p7 = scmp.lt.s32.totalorder %s3556_s21, %s3556_s21 }
  0x73   :  { %v180_v15 = vld [vmem:[#allocation8 + $0xa0] sm:$0xff]  ;;  %v181_v17 = vld [vmem:[#allocation8 + $0xa8] sm:$0xff]  ;;  %2507 = vmatpush1.bf16.msra.mxu0 %v3579_v5  ;;  %2636 = vmatpush1.bf16.msra.mxu1 %v3581_v9  ;;  %v3589_v19 = vcombine.low %v169_v11, %v173_v12  ;;  %p4454_p8 = scmp.lt.s32.totalorder %s4452_s4, %s4448_s22 }
  0x74   :  { %2508 = vmatprep.subr.bf16.mxu0 %v3588_v10  ;;  %v3596_v20 = vcombine.high %v176_v13, %v180_v15  ;;  %2637 = vmatprep.subr.bf16.mxu1 %v3590_v14  ;;  %v3598_v21 = vcombine.high %v177_v16, %v181_v17  ;;  %v184_v22 = vld [vmem:[#allocation8 + $0xc0] sm:$0xff]  ;;  %v185_v24 = vld [vmem:[#allocation8 + $0xc8] sm:$0xff]  ;;  %v3595_v26 = vcombine.low %v176_v13, %v180_v15 }
  0x75   :  { %v188_v23 = vld [vmem:[#allocation8 + $0xe0] sm:$0xff]  ;;  %v189_v25 = vld [vmem:[#allocation8 + $0xe8] sm:$0xff]  ;;  %v3597_v27 = vcombine.low %v177_v16, %v181_v17  ;;  %p4455_p9 = por %p4454_p8, %p4453_p7 }
  0x76   :  { %v3604_v28 = vcombine.high %v184_v22, %v188_v23  ;;  %v3606_v29 = vcombine.high %v185_v24, %v189_v25  ;;  %v192_v30 = vld [vmem:[#allocation8 + $0x100] sm:$0xff]  ;;  %v193_v32 = vld [vmem:[#allocation8 + $0x108] sm:$0xff]  ;;  %v3603_v34 = vcombine.low %v184_v22, %v188_v23  ;;  %v3605_v35 = vcombine.low %v185_v24, %v189_v25 }
  0x77   :  { %2509 = vmatpush1.bf16.msra.mxu0 %v3587_v18  ;;  %2638 = vmatpush1.bf16.msra.mxu1 %v3589_v19  ;;  %v196_v31 = vld [vmem:[#allocation8 + $0x120] sm:$0xff]  ;;  %v197_v33 = vld [vmem:[#allocation8 + $0x128] sm:$0xff]  ;;  %p4456_p10 = pnand %p4455_p9, %p4449_p6 }
  0x78   :  { %2510 = vmatprep.subr.bf16.mxu0 %v3596_v20  ;;  %2639 = vmatprep.subr.bf16.mxu1 %v3598_v21  ;;  %v3612_v36 = vcombine.high %v192_v30, %v196_v31  ;;  %v3614_v37 = vcombine.high %v193_v32, %v197_v33  ;;  %v200_v38 = vld [vmem:[#allocation8 + $0x140] sm:$0xff]  ;;  %v201_v40 = vld [vmem:[#allocation8 + $0x148] sm:$0xff]  ;;  %v3611_v42 = vcombine.low %v192_v30, %v196_v31 }
  0x79   :  { %v204_v39 = vld [vmem:[#allocation8 + $0x160] sm:$0xff]  ;;  %v205_v41 = vld [vmem:[#allocation8 + $0x168] sm:$0xff]  ;;  %v3613_v43 = vcombine.low %v193_v32, %v197_v33 }
  0x7a   :  { %v3620_v44 = vcombine.high %v200_v38, %v204_v39  ;;  %v3622_v45 = vcombine.high %v201_v40, %v205_v41  ;;  %v208_v46 = vld [vmem:[#allocation8 + $0x180] sm:$0xff]  ;;  %v209_v48 = vld [vmem:[#allocation8 + $0x188] sm:$0xff]  ;;  %v3619_v50 = vcombine.low %v200_v38, %v204_v39  ;;  %v3621_v51 = vcombine.low %v201_v40, %v205_v41 }
  0x7b   :  { %2511 = vmatpush1.bf16.msra.mxu0 %v3595_v26  ;;  %2640 = vmatpush1.bf16.msra.mxu1 %v3597_v27  ;;  %v212_v47 = vld [vmem:[#allocation8 + $0x1a0] sm:$0xff]  ;;  %v213_v49 = vld [vmem:[#allocation8 + $0x1a8] sm:$0xff] }
  0x7c   :  { %2512 = vmatprep.subr.bf16.mxu0 %v3604_v28  ;;  %2641 = vmatprep.subr.bf16.mxu1 %v3606_v29  ;;  %v3628_v52 = vcombine.high %v208_v46, %v212_v47  ;;  %v4609_v53 = vld [vmem:[#allocation2] sm:$0xff]  ;;  %v4611_v54 = vld [vmem:[#allocation5] sm:$0xff]  ;;  %v3630_v55 = vcombine.high %v209_v48, %v213_v49  ;;  %v3627_v62 = vcombine.low %v208_v46, %v212_v47 }
  0x7d   :  { %v216_v56 = vld [vmem:[#allocation8 + $0x1c0] sm:$0xff]  ;;  %v3568_v58 = vcombine.high %v4609_v53, %v4609_v53  ;;  %v3574_v59 = vcombine.high %v4611_v54, %v4611_v54  ;;  %v217_v60 = vld [vmem:[#allocation8 + $0x1c8] sm:$0xff]  ;;  %v3629_v0 = vcombine.low %v209_v48, %v213_v49 }
  0x7e   :  { %v220_v57 = vld [vmem:[#allocation8 + $0x1e0] sm:$0xff]  ;;  %v221_v61 = vld [vmem:[#allocation8 + $0x1e8] sm:$0xff] }
  0x7f   :  { %2513 = vmatpush1.bf16.msra.mxu0 %v3603_v34  ;;  %2642 = vmatpush1.bf16.msra.mxu1 %v3605_v35  ;;  %v4618_v63 = vsel %vm135_vm0, %v3568_v58, %v3574_v59  ;;  %v3636_v1 = vcombine.high %v216_v56, %v220_v57  ;;  %v3638_v2 = vcombine.high %v217_v60, %v221_v61  ;;  %v224_v3 = vld [vmem:[#allocation8 + $0x200] sm:$0xff]  ;;  %v225_v5 = vld [vmem:[#allocation8 + $0x208] sm:$0xff] }
  0x80   :  { %2514 = vmatprep.subr.bf16.mxu0 %v3612_v36  ;;  %2643 = vmatprep.subr.bf16.mxu1 %v3614_v37  ;;  %v228_v4 = vld [vmem:[#allocation8 + $0x220] sm:$0xff]  ;;  %v229_v6 = vld [vmem:[#allocation8 + $0x228] sm:$0xff]  ;;  %v3635_v7 = vcombine.low %v216_v56, %v220_v57  ;;  %v3637_v8 = vcombine.low %v217_v60, %v221_v61 }
  0x81   :  { %2538 = vmatprep.mubr.bf16.mxu0 %v4618_v63  ;;  %2667 = vmatprep.mubr.bf16.mxu1 %v4618_v63  ;;  %v3644_v9 = vcombine.high %v224_v3, %v228_v4  ;;  %v3646_v10 = vcombine.high %v225_v5, %v229_v6  ;;  %v232_v11 = vld [vmem:[#allocation8 + $0x240] sm:$0xff]  ;;  %v233_v13 = vld [vmem:[#allocation8 + $0x248] sm:$0xff]  ;;  %v3643_v15 = vcombine.low %v224_v3, %v228_v4 }
  0x82   :  { %v236_v12 = vld [vmem:[#allocation8 + $0x260] sm:$0xff]  ;;  %v237_v14 = vld [vmem:[#allocation8 + $0x268] sm:$0xff]  ;;  %v3645_v16 = vcombine.low %v225_v5, %v229_v6 }
  0x83   :  { %2515 = vmatpush1.bf16.msra.mxu0 %v3611_v42  ;;  %2644 = vmatpush1.bf16.msra.mxu1 %v3613_v43  ;;  %v3652_v17 = vcombine.high %v232_v11, %v236_v12  ;;  %v3654_v18 = vcombine.high %v233_v13, %v237_v14  ;;  %v240_v19 = vld [vmem:[#allocation8 + $0x280] sm:$0xff]  ;;  %v241_v21 = vld [vmem:[#allocation8 + $0x288] sm:$0xff]  ;;  %v3651_v23 = vcombine.low %v232_v11, %v236_v12 }
  0x84   :  { %2516 = vmatprep.subr.bf16.mxu0 %v3620_v44  ;;  %2645 = vmatprep.subr.bf16.mxu1 %v3622_v45  ;;  %v244_v20 = vld [vmem:[#allocation8 + $0x2a0] sm:$0xff]  ;;  %v245_v22 = vld [vmem:[#allocation8 + $0x2a8] sm:$0xff]  ;;  %v3653_v24 = vcombine.low %v233_v13, %v237_v14  ;;  %v3567_v11 = vcombine.low %v4609_v53, %v4609_v53  ;;  %v3573_v12 = vcombine.low %v4611_v54, %v4611_v54  ;;  %v4626_v13 = vld [vmem:[#allocation2 + $0x8] sm:$0xff] }
  0x85   :  { %v3660_v25 = vcombine.high %v240_v19, %v244_v20  ;;  %v3662_v26 = vcombine.high %v241_v21, %v245_v22  ;;  %v248_v27 = vld [vmem:[#allocation8 + $0x2c0] sm:$0xff]  ;;  %v249_v29 = vld [vmem:[#allocation8 + $0x2c8] sm:$0xff]  ;;  %v3659_v31 = vcombine.low %v240_v19, %v244_v20  ;;  %v3661_v32 = vcombine.low %v241_v21, %v245_v22 }
  0x86   :  { %v252_v28 = vld [vmem:[#allocation8 + $0x2e0] sm:$0xff]  ;;  %v253_v30 = vld [vmem:[#allocation8 + $0x2e8] sm:$0xff]  ;;  %v3570_v53 = vcombine.high %v4626_v13, %v4626_v13 }
  0x87   :  { %2517 = vmatpush1.bf16.msra.mxu0 %v3619_v50  ;;  %2646 = vmatpush1.bf16.msra.mxu1 %v3621_v51  ;;  %v3668_v33 = vcombine.high %v248_v27, %v252_v28  ;;  %v3670_v34 = vcombine.high %v249_v29, %v253_v30  ;;  %v256_v35 = vld [vmem:[#allocation8 + $0x300] sm:$0xff]  ;;  %v257_v37 = vld [vmem:[#allocation8 + $0x308] sm:$0xff]  ;;  %v3667_v39 = vcombine.low %v248_v27, %v252_v28 }
  0x88   :  { %2518 = vmatprep.subr.bf16.mxu0 %v3628_v52  ;;  %2647 = vmatprep.subr.bf16.mxu1 %v3630_v55  ;;  %v260_v36 = vld [vmem:[#allocation8 + $0x320] sm:$0xff]  ;;  %v261_v38 = vld [vmem:[#allocation8 + $0x328] sm:$0xff]  ;;  %v3669_v40 = vcombine.low %v249_v29, %v253_v30 }
  0x89   :  { %v3676_v41 = vcombine.high %v256_v35, %v260_v36  ;;  %v3678_v42 = vcombine.high %v257_v37, %v261_v38  ;;  %v264_v43 = vld [vmem:[#allocation8 + $0x340] sm:$0xff]  ;;  %v265_v45 = vld [vmem:[#allocation8 + $0x348] sm:$0xff]  ;;  %v3675_v47 = vcombine.low %v256_v35, %v260_v36  ;;  %v3677_v48 = vcombine.low %v257_v37, %v261_v38 }
  0x8a   :  { %v268_v44 = vld [vmem:[#allocation8 + $0x360] sm:$0xff]  ;;  %v269_v46 = vld [vmem:[#allocation8 + $0x368] sm:$0xff] }
  0x8b   :  { %2519 = vmatpush1.bf16.msra.mxu0 %v3627_v62  ;;  %2648 = vmatpush1.bf16.msra.mxu1 %v3629_v0  ;;  %v3684_v49 = vcombine.high %v264_v43, %v268_v44  ;;  %v3686_v50 = vcombine.high %v265_v45, %v269_v46  ;;  %v272_v51 = vld [vmem:[#allocation8 + $0x380] sm:$0xff]  ;;  %v273_v55 = vld [vmem:[#allocation8 + $0x388] sm:$0xff]  ;;  %v3683_v57 = vcombine.low %v264_v43, %v268_v44 }
  0x8c   :  { %2520 = vmatprep.subr.bf16.mxu0 %v3636_v1  ;;  %2649 = vmatprep.subr.bf16.mxu1 %v3638_v2  ;;  %v276_v52 = vld [vmem:[#allocation8 + $0x3a0] sm:$0xff]  ;;  %v277_v56 = vld [vmem:[#allocation8 + $0x3a8] sm:$0xff]  ;;  %v3685_v58 = vcombine.low %v265_v45, %v269_v46 }
  0x8d   :  { %v3692_v59 = vcombine.high %v272_v51, %v276_v52  ;;  %v3694_v60 = vcombine.high %v273_v55, %v277_v56  ;;  %v280_v61 = vld [vmem:[#allocation8 + $0x3c0] sm:$0xff]  ;;  %v281_v0 = vld [vmem:[#allocation8 + $0x3c8] sm:$0xff]  ;;  %v3691_v2 = vcombine.low %v272_v51, %v276_v52  ;;  %v3693_v3 = vcombine.low %v273_v55, %v277_v56 }
  0x8e   :  { %v284_v62 = vld [vmem:[#allocation8 + $0x3e0] sm:$0xff]  ;;  %v285_v1 = vld [vmem:[#allocation8 + $0x3e8] sm:$0xff] }
  0x8f   :  { %2521 = vmatpush1.bf16.msra.mxu0 %v3635_v7  ;;  %2650 = vmatpush1.bf16.msra.mxu1 %v3637_v8  ;;  %v3700_v4 = vcombine.high %v280_v61, %v284_v62  ;;  %v3702_v5 = vcombine.high %v281_v0, %v285_v1  ;;  %v288_v6 = vld [vmem:[#allocation8 + $0x400] sm:$0xff]  ;;  %v289_v8 = vld [vmem:[#allocation8 + $0x408] sm:$0xff] }
  0x90   :  { %2522 = vmatprep.subr.bf16.mxu0 %v3644_v9  ;;  %2651 = vmatprep.subr.bf16.mxu1 %v3646_v10  ;;  %v292_v7 = vld [vmem:[#allocation8 + $0x420] sm:$0xff]  ;;  %v293_v9 = vld [vmem:[#allocation8 + $0x428] sm:$0xff]  ;;  %v3699_v10 = vcombine.low %v280_v61, %v284_v62 }
  0x91   :  { %v4628_v14 = vld [vmem:[#allocation5 + $0x8] sm:$0xff]  ;;  %v300_v19 = vld [vmem:[#allocation8 + $0x460] sm:$0xff]  ;;  %v3707_v22 = vcombine.low %v288_v6, %v292_v7 }
  0x92   :  { %v297_v20 = vld [vmem:[#allocation8 + $0x448] sm:$0xff]  ;;  %v3576_v54 = vcombine.high %v4628_v14, %v4628_v14  ;;  %v304_v27 = vld [vmem:[#allocation8 + $0x480] sm:$0xff] }
  0x93   :  { %2523 = vmatpush1.bf16.msra.mxu0 %v3643_v15  ;;  %2652 = vmatpush1.bf16.msra.mxu1 %v3645_v16  ;;  %v3701_v15 = vcombine.low %v281_v0, %v285_v1  ;;  %v3708_v16 = vcombine.high %v288_v6, %v292_v7  ;;  %v301_v21 = vld [vmem:[#allocation8 + $0x468] sm:$0xff]  ;;  %v308_v28 = vld [vmem:[#allocation8 + $0x4a0] sm:$0xff] }
  0x94   :  { %2524 = vmatprep.subr.bf16.mxu0 %v3652_v17  ;;  %2653 = vmatprep.subr.bf16.mxu1 %v3654_v18  ;;  %v3710_v17 = vcombine.high %v289_v8, %v293_v9  ;;  %v296_v18 = vld [vmem:[#allocation8 + $0x440] sm:$0xff]  ;;  %v305_v29 = vld [vmem:[#allocation8 + $0x488] sm:$0xff] }
  0x95   :  { %v309_v30 = vld [vmem:[#allocation8 + $0x4a8] sm:$0xff]  ;;  %v312_v36 = vld [vmem:[#allocation8 + $0x4c0] sm:$0xff] }
  0x96   :  { %v3726_v35 = vcombine.high %v305_v29, %v309_v30  ;;  %v316_v37 = vld [vmem:[#allocation8 + $0x4e0] sm:$0xff]  ;;  %v313_v38 = vld [vmem:[#allocation8 + $0x4c8] sm:$0xff] }
  0x97   :  { %2525 = vmatpush1.bf16.msra.mxu0 %v3651_v23  ;;  %2654 = vmatpush1.bf16.msra.mxu1 %v3653_v24  ;;  %v4635_v23 = vsel %vm135_vm0, %v3567_v11, %v3573_v12  ;;  %v3709_v24 = vcombine.low %v289_v8, %v293_v9  ;;  %v320_v44 = vld [vmem:[#allocation8 + $0x500] sm:$0xff]  ;;  %v321_v46 = vld [vmem:[#allocation8 + $0x508] sm:$0xff] }
  0x98   :  { %2526 = vmatprep.subr.bf16.mxu0 %v3660_v25  ;;  %2655 = vmatprep.subr.bf16.mxu1 %v3662_v26  ;;  %v3716_v25 = vcombine.high %v296_v18, %v300_v19  ;;  %v3718_v26 = vcombine.high %v297_v20, %v301_v21  ;;  %v324_v45 = vld [vmem:[#allocation8 + $0x520] sm:$0xff]  ;;  %v329_v56 = vld [vmem:[#allocation8 + $0x548] sm:$0xff] }
  0x99   :  { %v328_v52 = vld [vmem:[#allocation8 + $0x540] sm:$0xff]  ;;  %v337_v1 = vld [vmem:[#allocation8 + $0x588] sm:$0xff] }
  0x9a   :  { %v332_v55 = vld [vmem:[#allocation8 + $0x560] sm:$0xff]  ;;  %v345_v9 = vld [vmem:[#allocation8 + $0x5c8] sm:$0xff] }
  0x9b   :  { %2527 = vmatpush1.bf16.msra.mxu0 %v3659_v31  ;;  %2656 = vmatpush1.bf16.msra.mxu1 %v3661_v32  ;;  %v4639_v31 = vsel %vm135_vm0, %v3570_v53, %v3576_v54  ;;  %v3715_v32 = vcombine.low %v296_v18, %v300_v19  ;;  %v336_v62 = vld [vmem:[#allocation8 + $0x580] sm:$0xff]  ;;  %v353_v19 = vld [vmem:[#allocation8 + $0x608] sm:$0xff] }
  0x9c   :  { %2528 = vmatprep.subr.bf16.mxu0 %v3668_v33  ;;  %2657 = vmatprep.subr.bf16.mxu1 %v3670_v34  ;;  %v3717_v33 = vcombine.low %v297_v20, %v301_v21  ;;  %v3724_v34 = vcombine.high %v304_v27, %v308_v28  ;;  %v340_v0 = vld [vmem:[#allocation8 + $0x5a0] sm:$0xff]  ;;  %v357_v20 = vld [vmem:[#allocation8 + $0x628] sm:$0xff] }
  0x9d   :  { %v344_v7 = vld [vmem:[#allocation8 + $0x5c0] sm:$0xff]  ;;  %v3755_v11 = vcombine.low %v336_v62, %v340_v0 }
  0x9e   :  { %v348_v8 = vld [vmem:[#allocation8 + $0x5e0] sm:$0xff] }
  0x9f   :  { %2529 = vmatpush1.bf16.msra.mxu0 %v3667_v39  ;;  %2658 = vmatpush1.bf16.msra.mxu1 %v3669_v40  ;;  %v317_v39 = vld [vmem:[#allocation8 + $0x4e8] sm:$0xff]  ;;  %v3723_v40 = vcombine.low %v304_v27, %v308_v28  ;;  %v356_v18 = vld [vmem:[#allocation8 + $0x620] sm:$0xff]  ;;  %v3763_v21 = vcombine.low %v344_v7, %v348_v8 }
  0xa0   :  { %2530 = vmatprep.subr.bf16.mxu0 %v3676_v41  ;;  %2659 = vmatprep.subr.bf16.mxu1 %v3678_v42  ;;  %v3725_v41 = vcombine.low %v305_v29, %v309_v30  ;;  %v3732_v42 = vcombine.high %v312_v36, %v316_v37  ;;  %v3734_v43 = vcombine.high %v313_v38, %v317_v39  ;;  %v365_v27 = vld [vmem:[#allocation8 + $0x668] sm:$0xff] }
  0xa1   :  { %v3773_v29 = vcombine.low %v353_v19, %v357_v20 }
  0xa3   :  { %2531 = vmatpush1.bf16.msra.mxu0 %v3675_v47  ;;  %2660 = vmatpush1.bf16.msra.mxu1 %v3677_v48  ;;  %v325_v47 = vld [vmem:[#allocation8 + $0x528] sm:$0xff]  ;;  %v3731_v48 = vcombine.low %v312_v36, %v316_v37 }
  0xa4   :  { %2532 = vmatprep.subr.bf16.mxu0 %v3684_v49  ;;  %2661 = vmatprep.subr.bf16.mxu1 %v3686_v50  ;;  %v3733_v49 = vcombine.low %v313_v38, %v317_v39  ;;  %v3740_v50 = vcombine.high %v320_v44, %v324_v45  ;;  %v3742_v51 = vcombine.high %v321_v46, %v325_v47  ;;  %v373_v36 = vld [vmem:[#allocation8 + $0x6a8] sm:$0xff] }
  0xa7   :  { %2533 = vmatpush1.bf16.msra.mxu0 %v3683_v57  ;;  %2662 = vmatpush1.bf16.msra.mxu1 %v3685_v58  ;;  %v333_v57 = vld [vmem:[#allocation8 + $0x568] sm:$0xff]  ;;  %v3739_v58 = vcombine.low %v320_v44, %v324_v45 }
  0xa8   :  { %2534 = vmatprep.subr.bf16.mxu0 %v3692_v59  ;;  %2663 = vmatprep.subr.bf16.mxu1 %v3694_v60  ;;  %v3741_v59 = vcombine.low %v321_v46, %v325_v47  ;;  %v3748_v60 = vcombine.high %v328_v52, %v332_v55  ;;  %v3750_v61 = vcombine.high %v329_v56, %v333_v57  ;;  %v381_v44 = vld [vmem:[#allocation8 + $0x6e8] sm:$0xff] }
  0xab   :  { %2535 = vmatpush1.bf16.msra.mxu0 %v3691_v2  ;;  %2664 = vmatpush1.bf16.msra.mxu1 %v3693_v3  ;;  %v341_v2 = vld [vmem:[#allocation8 + $0x5a8] sm:$0xff]  ;;  %v3747_v3 = vcombine.low %v328_v52, %v332_v55 }
  0xac   :  { %2536 = vmatprep.subr.bf16.mxu0 %v3700_v4  ;;  %2665 = vmatprep.subr.bf16.mxu1 %v3702_v5  ;;  %v3749_v4 = vcombine.low %v329_v56, %v333_v57  ;;  %v3756_v5 = vcombine.high %v336_v62, %v340_v0  ;;  %v3758_v6 = vcombine.high %v337_v1, %v341_v2  ;;  %v389_v52 = vld [vmem:[#allocation8 + $0x728] sm:$0xff] }
  0xad   :  { %v3757_v12 = vcombine.low %v337_v1, %v341_v2  ;;  %v397_v62 = vld [vmem:[#allocation8 + $0x768] sm:$0xff] }
  0xaf   :  { %2537 = vmatpush1.bf16.msra.mxu0 %v3699_v10  ;;  %2666 = vmatpush1.bf16.msra.mxu1 %v3701_v15  ;;  %v349_v10 = vld [vmem:[#allocation8 + $0x5e8] sm:$0xff]  ;;  %v3764_v15 = vcombine.high %v344_v7, %v348_v8 }
  0xb0   :  { %2549 = vmatprep.subr.bf16.mxu0 %v3708_v16  ;;  %2678 = vmatprep.subr.bf16.mxu1 %v3710_v17  ;;  %v3766_v16 = vcombine.high %v345_v9, %v349_v10  ;;  %v352_v17 = vld [vmem:[#allocation8 + $0x600] sm:$0xff]  ;;  %v3765_v53 = vcombine.low %v345_v9, %v349_v10  ;;  %v405_v7 = vld [vmem:[#allocation8 + $0x7a8] sm:$0xff] }
  0xb1   :  { %v3772_v54 = vcombine.high %v352_v17, %v356_v18  ;;  %v3771_v28 = vcombine.low %v352_v17, %v356_v18  ;;  %v413_v17 = vld [vmem:[#allocation8 + $0x7e8] sm:$0xff] }
  0xb2   :  { %2539 = vmatmul.mubr.bf16.vlgmr.msra.gmra.mrb[0].mxu0 %v4635_v23  ;;  %2668 = vmatmul.mubr.bf16.vlgmr.msra.gmra.mrb[0].mxu1 %v4635_v23 }
  0xb3   :  { %2550 = vmatpush1.bf16.msra.mxu0 %v3707_v22  ;;  %2679 = vmatpush1.bf16.msra.mxu1 %v3709_v24  ;;  %v3774_v22 = vcombine.high %v353_v19, %v357_v20  ;;  %v360_v24 = vld [vmem:[#allocation8 + $0x640] sm:$0xff] }
  0xb4   :  { %2551 = vmatprep.subr.bf16.mxu0 %v3716_v25  ;;  %2680 = vmatprep.subr.bf16.mxu1 %v3718_v26  ;;  %v364_v25 = vld [vmem:[#allocation8 + $0x660] sm:$0xff]  ;;  %v361_v26 = vld [vmem:[#allocation8 + $0x648] sm:$0xff] }
  0xb5   :  { %2581 = vmatprep.mubr.bf16.mxu0 %v4639_v31  ;;  %2710 = vmatprep.mubr.bf16.mxu1 %v4639_v31  ;;  %v3780_v30 = vcombine.high %v360_v24, %v364_v25  ;;  %v3779_v37 = vcombine.low %v360_v24, %v364_v25  ;;  %v3781_v38 = vcombine.low %v361_v26, %v365_v27  ;;  %v421_v24 = vld [vmem:[#allocation8 + $0x828] sm:$0xff] }
  0xb7   :  { %2552 = vmatpush1.bf16.msra.mxu0 %v3715_v32  ;;  %2681 = vmatpush1.bf16.msra.mxu1 %v3717_v33  ;;  %v3782_v32 = vcombine.high %v361_v26, %v365_v27  ;;  %v368_v33 = vld [vmem:[#allocation8 + $0x680] sm:$0xff]  ;;  %v3569_v26 = vcombine.low %v4626_v13, %v4626_v13  ;;  %v3575_v27 = vcombine.low %v4628_v14, %v4628_v14 }
  0xb8   :  { %2553 = vmatprep.subr.bf16.mxu0 %v3724_v34  ;;  %2682 = vmatprep.subr.bf16.mxu1 %v3726_v35  ;;  %v372_v34 = vld [vmem:[#allocation8 + $0x6a0] sm:$0xff]  ;;  %v369_v35 = vld [vmem:[#allocation8 + $0x688] sm:$0xff] }
  0xb9   :  { %v3788_v39 = vcombine.high %v368_v33, %v372_v34  ;;  %v3787_v45 = vcombine.low %v368_v33, %v372_v34  ;;  %v3789_v46 = vcombine.low %v369_v35, %v373_v36  ;;  %v424_v34 = vld [vmem:[#allocation8 + $0x840] sm:$0xff] }
  0xbb   :  { %2554 = vmatpush1.bf16.msra.mxu0 %v3723_v40  ;;  %2683 = vmatpush1.bf16.msra.mxu1 %v3725_v41  ;;  %v3790_v40 = vcombine.high %v369_v35, %v373_v36  ;;  %v376_v41 = vld [vmem:[#allocation8 + $0x6c0] sm:$0xff]  ;;  %v425_v36 = vld [vmem:[#allocation8 + $0x848] sm:$0xff] }
  0xbc   :  { %2555 = vmatprep.subr.bf16.mxu0 %v3732_v42  ;;  %2684 = vmatprep.subr.bf16.mxu1 %v3734_v43  ;;  %v380_v42 = vld [vmem:[#allocation8 + $0x6e0] sm:$0xff]  ;;  %v377_v43 = vld [vmem:[#allocation8 + $0x6c8] sm:$0xff] }
  0xbd   :  { %v3796_v47 = vcombine.high %v376_v41, %v380_v42  ;;  %v3795_v55 = vcombine.low %v376_v41, %v380_v42  ;;  %v3797_v56 = vcombine.low %v377_v43, %v381_v44  ;;  %v428_v35 = vld [vmem:[#allocation8 + $0x860] sm:$0xff] }
  0xbe   :  { %v3844_v41 = vcombine.high %v424_v34, %v428_v35 }
  0xbf   :  { %2556 = vmatpush1.bf16.msra.mxu0 %v3731_v48  ;;  %2685 = vmatpush1.bf16.msra.mxu1 %v3733_v49  ;;  %v3798_v48 = vcombine.high %v377_v43, %v381_v44  ;;  %v384_v49 = vld [vmem:[#allocation8 + $0x700] sm:$0xff] }
  0xc0   :  { %2557 = vmatprep.subr.bf16.mxu0 %v3740_v50  ;;  %2686 = vmatprep.subr.bf16.mxu1 %v3742_v51  ;;  %v388_v50 = vld [vmem:[#allocation8 + $0x720] sm:$0xff]  ;;  %v385_v51 = vld [vmem:[#allocation8 + $0x708] sm:$0xff] }
  0xc1   :  { %v3804_v57 = vcombine.high %v384_v49, %v388_v50  ;;  %v3803_v0 = vcombine.low %v384_v49, %v388_v50  ;;  %v3805_v1 = vcombine.low %v385_v51, %v389_v52  ;;  %v432_v43 = vld [vmem:[#allocation8 + $0x880] sm:$0xff] }
  0xc2   :  { %v436_v44 = vld [vmem:[#allocation8 + $0x8a0] sm:$0xff] }
  0xc3   :  { %2558 = vmatpush1.bf16.msra.mxu0 %v3739_v58  ;;  %2687 = vmatpush1.bf16.msra.mxu1 %v3741_v59  ;;  %v3806_v58 = vcombine.high %v385_v51, %v389_v52  ;;  %v392_v59 = vld [vmem:[#allocation8 + $0x740] sm:$0xff]  ;;  %v3852_v50 = vcombine.high %v432_v43, %v436_v44 }
  0xc4   :  { %2559 = vmatprep.subr.bf16.mxu0 %v3748_v60  ;;  %2688 = vmatprep.subr.bf16.mxu1 %v3750_v61  ;;  %v396_v60 = vld [vmem:[#allocation8 + $0x760] sm:$0xff]  ;;  %v393_v61 = vld [vmem:[#allocation8 + $0x748] sm:$0xff] }
  0xc5   :  { %v3812_v2 = vcombine.high %v392_v59, %v396_v60  ;;  %v3811_v8 = vcombine.low %v392_v59, %v396_v60  ;;  %v3813_v9 = vcombine.low %v393_v61, %v397_v62  ;;  %v440_v52 = vld [vmem:[#allocation8 + $0x8c0] sm:$0xff] }
  0xc7   :  { %2560 = vmatpush1.bf16.msra.mxu0 %v3747_v3  ;;  %2689 = vmatpush1.bf16.msra.mxu1 %v3749_v4  ;;  %v3814_v3 = vcombine.high %v393_v61, %v397_v62  ;;  %v400_v4 = vld [vmem:[#allocation8 + $0x780] sm:$0xff] }
  0xc8   :  { %2561 = vmatprep.subr.bf16.mxu0 %v3756_v5  ;;  %2690 = vmatprep.subr.bf16.mxu1 %v3758_v6  ;;  %v404_v5 = vld [vmem:[#allocation8 + $0x7a0] sm:$0xff]  ;;  %v401_v6 = vld [vmem:[#allocation8 + $0x788] sm:$0xff] }
  0xc9   :  { %v3820_v10 = vcombine.high %v400_v4, %v404_v5  ;;  %v3819_v18 = vcombine.low %v400_v4, %v404_v5  ;;  %v3821_v19 = vcombine.low %v401_v6, %v405_v7  ;;  %v448_v62 = vld [vmem:[#allocation8 + $0x900] sm:$0xff] }
  0xcb   :  { %2562 = vmatpush1.bf16.msra.mxu0 %v3755_v11  ;;  %2691 = vmatpush1.bf16.msra.mxu1 %v3757_v12  ;;  %v3822_v11 = vcombine.high %v401_v6, %v405_v7  ;;  %v408_v12 = vld [vmem:[#allocation8 + $0x7c0] sm:$0xff] }
  0xcc   :  { %2563 = vmatprep.subr.bf16.mxu0 %v3764_v15  ;;  %2692 = vmatprep.subr.bf16.mxu1 %v3766_v16  ;;  %v412_v15 = vld [vmem:[#allocation8 + $0x7e0] sm:$0xff]  ;;  %v409_v16 = vld [vmem:[#allocation8 + $0x7c8] sm:$0xff] }
  0xcd   :  { %v3828_v20 = vcombine.high %v408_v12, %v412_v15  ;;  %v3827_v25 = vcombine.low %v408_v12, %v412_v15  ;;  %v456_v7 = vld [vmem:[#allocation8 + $0x940] sm:$0xff] }
  0xcf   :  { %2564 = vmatpush1.bf16.msra.mxu0 %v3763_v21  ;;  %2693 = vmatpush1.bf16.msra.mxu1 %v3765_v53  ;;  %v3830_v21 = vcombine.high %v409_v16, %v413_v17  ;;  %v416_v53 = vld [vmem:[#allocation8 + $0x800] sm:$0xff] }
  0xd0   :  { %2565 = vmatprep.subr.bf16.mxu0 %v3772_v54  ;;  %2694 = vmatprep.subr.bf16.mxu1 %v3774_v22  ;;  %v420_v54 = vld [vmem:[#allocation8 + $0x820] sm:$0xff]  ;;  %v417_v22 = vld [vmem:[#allocation8 + $0x808] sm:$0xff] }
  0xd1   :  { %v3838_v33 = vcombine.high %v417_v22, %v421_v24 }
  0xd3   :  { %2566 = vmatpush1.bf16.msra.mxu0 %v3771_v28  ;;  %2695 = vmatpush1.bf16.msra.mxu1 %v3773_v29  ;;  %v4648_v28 = vld [vmem:[#allocation2 + $0x10] sm:$0xff]  ;;  %v4650_v29 = vld [vmem:[#allocation5 + $0x10] sm:$0xff] }
  0xd4   :  { %2567 = vmatprep.subr.bf16.mxu0 %v3780_v30  ;;  %2696 = vmatprep.subr.bf16.mxu1 %v3782_v32  ;;  %v3829_v30 = vcombine.low %v409_v16, %v413_v17  ;;  %v3836_v32 = vcombine.high %v416_v53, %v420_v54  ;;  %v3572_v13 = vcombine.high %v4648_v28, %v4648_v28  ;;  %v464_v17 = vld [vmem:[#allocation8 + $0x980] sm:$0xff] }
  0xd5   :  { %v3578_v14 = vcombine.high %v4650_v29, %v4650_v29 }
  0xd7   :  { %2568 = vmatpush1.bf16.msra.mxu0 %v3779_v37  ;;  %2697 = vmatpush1.bf16.msra.mxu1 %v3781_v38  ;;  %v429_v37 = vld [vmem:[#allocation8 + $0x868] sm:$0xff]  ;;  %v3835_v38 = vcombine.low %v416_v53, %v420_v54 }
  0xd8   :  { %2569 = vmatprep.subr.bf16.mxu0 %v3788_v39  ;;  %2698 = vmatprep.subr.bf16.mxu1 %v3790_v40  ;;  %v4657_v39 = vsel %vm135_vm0, %v3569_v26, %v3575_v27  ;;  %v3837_v40 = vcombine.low %v417_v22, %v421_v24  ;;  %v3846_v42 = vcombine.high %v425_v36, %v429_v37  ;;  %v472_v24 = vld [vmem:[#allocation8 + $0x9c0] sm:$0xff]  ;;  %v473_v26 = vld [vmem:[#allocation8 + $0x9c8] sm:$0xff] }
  0xd9   :  { %v3845_v49 = vcombine.low %v425_v36, %v429_v37  ;;  %v477_v27 = vld [vmem:[#allocation8 + $0x9e8] sm:$0xff]  ;;  %v484_v36 = vld [vmem:[#allocation8 + $0xa20] sm:$0xff] }
  0xda   :  { %v481_v37 = vld [vmem:[#allocation8 + $0xa08] sm:$0xff] }
  0xdb   :  { %2570 = vmatpush1.bf16.msra.mxu0 %v3787_v45  ;;  %2699 = vmatpush1.bf16.msra.mxu1 %v3789_v46  ;;  %v433_v45 = vld [vmem:[#allocation8 + $0x888] sm:$0xff] }
  0xdc   :  { %2571 = vmatprep.subr.bf16.mxu0 %v3796_v47  ;;  %2700 = vmatprep.subr.bf16.mxu1 %v3798_v48  ;;  %v437_v46 = vld [vmem:[#allocation8 + $0x8a8] sm:$0xff]  ;;  %v4661_v47 = vsel %vm135_vm0, %v3572_v13, %v3578_v14  ;;  %v3843_v48 = vcombine.low %v424_v34, %v428_v35  ;;  %v3894_v34 = vcombine.high %v473_v26, %v477_v27  ;;  %v480_v35 = vld [vmem:[#allocation8 + $0xa00] sm:$0xff] }
  0xdd   :  { %v3854_v51 = vcombine.high %v433_v45, %v437_v46  ;;  %v3853_v59 = vcombine.low %v433_v45, %v437_v46  ;;  %v485_v13 = vld [vmem:[#allocation8 + $0xa28] sm:$0xff]  ;;  %v3899_v46 = vcombine.low %v480_v35, %v484_v36 }
  0xde   :  { %v493_v45 = vld [vmem:[#allocation8 + $0xa68] sm:$0xff] }
  0xdf   :  { %2572 = vmatpush1.bf16.msra.mxu0 %v3795_v55  ;;  %2701 = vmatpush1.bf16.msra.mxu1 %v3797_v56  ;;  %v444_v55 = vld [vmem:[#allocation8 + $0x8e0] sm:$0xff]  ;;  %v441_v56 = vld [vmem:[#allocation8 + $0x8c8] sm:$0xff] }
  0xe0   :  { %2573 = vmatprep.subr.bf16.mxu0 %v3804_v57  ;;  %2702 = vmatprep.subr.bf16.mxu1 %v3806_v58  ;;  %v445_v57 = vld [vmem:[#allocation8 + $0x8e8] sm:$0xff]  ;;  %v3851_v58 = vcombine.low %v432_v43, %v436_v44  ;;  %v3860_v60 = vcombine.high %v440_v52, %v444_v55  ;;  %v492_v43 = vld [vmem:[#allocation8 + $0xa60] sm:$0xff] }
  0xe1   :  { %v3862_v61 = vcombine.high %v441_v56, %v445_v57  ;;  %v3861_v4 = vcombine.low %v441_v56, %v445_v57  ;;  %v489_v44 = vld [vmem:[#allocation8 + $0xa48] sm:$0xff] }
  0xe2   :  { %v501_v56 = vld [vmem:[#allocation8 + $0xaa8] sm:$0xff] }
  0xe3   :  { %2574 = vmatpush1.bf16.msra.mxu0 %v3803_v0  ;;  %2703 = vmatpush1.bf16.msra.mxu1 %v3805_v1  ;;  %v452_v0 = vld [vmem:[#allocation8 + $0x920] sm:$0xff]  ;;  %v449_v1 = vld [vmem:[#allocation8 + $0x908] sm:$0xff] }
  0xe4   :  { %2575 = vmatprep.subr.bf16.mxu0 %v3812_v2  ;;  %2704 = vmatprep.subr.bf16.mxu1 %v3814_v3  ;;  %v453_v2 = vld [vmem:[#allocation8 + $0x928] sm:$0xff]  ;;  %v3859_v3 = vcombine.low %v440_v52, %v444_v55  ;;  %v3868_v5 = vcombine.high %v448_v62, %v452_v0  ;;  %v500_v52 = vld [vmem:[#allocation8 + $0xaa0] sm:$0xff] }
  0xe5   :  { %v3870_v6 = vcombine.high %v449_v1, %v453_v2  ;;  %v3869_v12 = vcombine.low %v449_v1, %v453_v2  ;;  %v497_v55 = vld [vmem:[#allocation8 + $0xa88] sm:$0xff] }
  0xe6   :  { %v509_v1 = vld [vmem:[#allocation8 + $0xae8] sm:$0xff] }
  0xe7   :  { %2576 = vmatpush1.bf16.msra.mxu0 %v3811_v8  ;;  %2705 = vmatpush1.bf16.msra.mxu1 %v3813_v9  ;;  %v460_v8 = vld [vmem:[#allocation8 + $0x960] sm:$0xff]  ;;  %v457_v9 = vld [vmem:[#allocation8 + $0x948] sm:$0xff] }
  0xe8   :  { %2577 = vmatprep.subr.bf16.mxu0 %v3820_v10  ;;  %2706 = vmatprep.subr.bf16.mxu1 %v3822_v11  ;;  %v461_v10 = vld [vmem:[#allocation8 + $0x968] sm:$0xff]  ;;  %v3867_v11 = vcombine.low %v448_v62, %v452_v0  ;;  %v3876_v15 = vcombine.high %v456_v7, %v460_v8  ;;  %v508_v62 = vld [vmem:[#allocation8 + $0xae0] sm:$0xff] }
  0xe9   :  { %v3878_v16 = vcombine.high %v457_v9, %v461_v10  ;;  %v3877_v53 = vcombine.low %v457_v9, %v461_v10  ;;  %v505_v0 = vld [vmem:[#allocation8 + $0xac8] sm:$0xff] }
  0xea   :  { %v517_v9 = vld [vmem:[#allocation8 + $0xb28] sm:$0xff] }
  0xeb   :  { %2578 = vmatpush1.bf16.msra.mxu0 %v3819_v18  ;;  %2707 = vmatpush1.bf16.msra.mxu1 %v3821_v19  ;;  %v468_v18 = vld [vmem:[#allocation8 + $0x9a0] sm:$0xff]  ;;  %v465_v19 = vld [vmem:[#allocation8 + $0x988] sm:$0xff] }
  0xec   :  { %2579 = vmatprep.subr.bf16.mxu0 %v3828_v20  ;;  %2708 = vmatprep.subr.bf16.mxu1 %v3830_v21  ;;  %v469_v20 = vld [vmem:[#allocation8 + $0x9a8] sm:$0xff]  ;;  %v3875_v21 = vcombine.low %v456_v7, %v460_v8  ;;  %v3884_v54 = vcombine.high %v464_v17, %v468_v18  ;;  %v516_v7 = vld [vmem:[#allocation8 + $0xb20] sm:$0xff] }
  0xed   :  { %v3886_v22 = vcombine.high %v465_v19, %v469_v20  ;;  %v513_v8 = vld [vmem:[#allocation8 + $0xb08] sm:$0xff] }
  0xef   :  { %2580 = vmatpush1.bf16.msra.mxu0 %v3827_v25  ;;  %2709 = vmatpush1.bf16.msra.mxu1 %v3829_v30  ;;  %v476_v25 = vld [vmem:[#allocation8 + $0x9e0] sm:$0xff]  ;;  %v3883_v30 = vcombine.low %v464_v17, %v468_v18  ;;  %v521_v18 = vld [vmem:[#allocation8 + $0xb48] sm:$0xff] }
  0xf0   :  { %2592 = vmatprep.subr.bf16.mxu0 %v3836_v32  ;;  %2721 = vmatprep.subr.bf16.mxu1 %v3838_v33  ;;  %v3885_v32 = vcombine.low %v465_v19, %v469_v20  ;;  %v3892_v33 = vcombine.high %v472_v24, %v476_v25  ;;  %v3891_v14 = vcombine.low %v472_v24, %v476_v25  ;;  %v524_v17 = vld [vmem:[#allocation8 + $0xb60] sm:$0xff]  ;;  %v525_v19 = vld [vmem:[#allocation8 + $0xb68] sm:$0xff] }
  0xf1   :  { %v532_v24 = vld [vmem:[#allocation8 + $0xba0] sm:$0xff]  ;;  %v529_v25 = vld [vmem:[#allocation8 + $0xb88] sm:$0xff] }
  0xf2   :  { %2582 = vmatmul.mubr.bf16.vlgmr.msra.gmra.mrb[0].mxu0 %v4657_v39  ;;  %2711 = vmatmul.mubr.bf16.vlgmr.msra.gmra.mrb[0].mxu1 %v4657_v39 }
  0xf3   :  { %2593 = vmatpush1.bf16.msra.mxu0 %v3835_v38  ;;  %2722 = vmatpush1.bf16.msra.mxu1 %v3837_v40  ;;  %v3893_v38 = vcombine.low %v473_v26, %v477_v27  ;;  %v3900_v40 = vcombine.high %v480_v35, %v484_v36  ;;  %v533_v26 = vld [vmem:[#allocation8 + $0xba8] sm:$0xff]  ;;  %v540_v35 = vld [vmem:[#allocation8 + $0xbe0] sm:$0xff] }
  0xf4   :  { %2594 = vmatprep.subr.bf16.mxu0 %v3844_v41  ;;  %2723 = vmatprep.subr.bf16.mxu1 %v3846_v42  ;;  %v3902_v41 = vcombine.high %v481_v37, %v485_v13  ;;  %v488_v42 = vld [vmem:[#allocation8 + $0xa40] sm:$0xff]  ;;  %v537_v36 = vld [vmem:[#allocation8 + $0xbc8] sm:$0xff] }
  0xf5   :  { %2624 = vmatprep.mubr.bf16.mxu0 %v4661_v47  ;;  %2753 = vmatprep.mubr.bf16.mxu1 %v4661_v47  ;;  %v3907_v57 = vcombine.low %v488_v42, %v492_v43 }
  0xf7   :  { %2595 = vmatpush1.bf16.msra.mxu0 %v3843_v48  ;;  %2724 = vmatpush1.bf16.msra.mxu1 %v3845_v49  ;;  %v3901_v48 = vcombine.low %v481_v37, %v485_v13  ;;  %v3908_v49 = vcombine.high %v488_v42, %v492_v43  ;;  %v541_v37 = vld [vmem:[#allocation8 + $0xbe8] sm:$0xff]  ;;  %v166_v42 = vld [vmem:[#allocation8 + $0x30] sm:$0xff]  ;;  %v163_v43 = vld [vmem:[#allocation8 + $0x18] sm:$0xff] }
  0xf8   :  { %2596 = vmatprep.subr.bf16.mxu0 %v3852_v50  ;;  %2725 = vmatprep.subr.bf16.mxu1 %v3854_v51  ;;  %v3910_v50 = vcombine.high %v489_v44, %v493_v45  ;;  %v496_v51 = vld [vmem:[#allocation8 + $0xa80] sm:$0xff] }
  0xf9   :  { %v3915_v2 = vcombine.low %v496_v51, %v500_v52 }
  0xfb   :  { %2597 = vmatpush1.bf16.msra.mxu0 %v3851_v58  ;;  %2726 = vmatpush1.bf16.msra.mxu1 %v3853_v59  ;;  %v3909_v58 = vcombine.low %v489_v44, %v493_v45  ;;  %v3916_v59 = vcombine.high %v496_v51, %v500_v52  ;;  %v167_v44 = vld [vmem:[#allocation8 + $0x38] sm:$0xff]  ;;  %v170_v52 = vld [vmem:[#allocation8 + $0x50] sm:$0xff] }
  0xfc   :  { %2598 = vmatprep.subr.bf16.mxu0 %v3860_v60  ;;  %2727 = vmatprep.subr.bf16.mxu1 %v3862_v61  ;;  %v3918_v60 = vcombine.high %v497_v55, %v501_v56  ;;  %v504_v61 = vld [vmem:[#allocation8 + $0xac0] sm:$0xff]  ;;  %v3586_v51 = vcombine.high %v163_v43, %v167_v44 }
  0xfd   :  { %v3923_v10 = vcombine.low %v504_v61, %v508_v62 }
  0xff   :  { %2599 = vmatpush1.bf16.msra.mxu0 %v3859_v3  ;;  %2728 = vmatpush1.bf16.msra.mxu1 %v3861_v4  ;;  %v3917_v3 = vcombine.low %v497_v55, %v501_v56  ;;  %v3924_v4 = vcombine.high %v504_v61, %v508_v62  ;;  %v174_v55 = vld [vmem:[#allocation8 + $0x70] sm:$0xff]  ;;  %v171_v56 = vld [vmem:[#allocation8 + $0x58] sm:$0xff] }
 0x100   :  { %2600 = vmatprep.subr.bf16.mxu0 %v3868_v5  ;;  %2729 = vmatprep.subr.bf16.mxu1 %v3870_v6  ;;  %v3926_v5 = vcombine.high %v505_v0, %v509_v1  ;;  %v512_v6 = vld [vmem:[#allocation8 + $0xb00] sm:$0xff]  ;;  %v178_v61 = vld [vmem:[#allocation8 + $0x90] sm:$0xff] }
 0x101   :  { %v3931_v20 = vcombine.low %v512_v6, %v516_v7  ;;  %v182_v62 = vld [vmem:[#allocation8 + $0xb0] sm:$0xff] }
 0x103   :  { %2601 = vmatpush1.bf16.msra.mxu0 %v3867_v11  ;;  %2730 = vmatpush1.bf16.msra.mxu1 %v3869_v12  ;;  %v3925_v11 = vcombine.low %v505_v0, %v509_v1  ;;  %v3932_v12 = vcombine.high %v512_v6, %v516_v7  ;;  %v179_v0 = vld [vmem:[#allocation8 + $0x98] sm:$0xff]  ;;  %v186_v6 = vld [vmem:[#allocation8 + $0xd0] sm:$0xff] }
 0x104   :  { %2602 = vmatprep.subr.bf16.mxu0 %v3876_v15  ;;  %2731 = vmatprep.subr.bf16.mxu1 %v3878_v16  ;;  %v3934_v15 = vcombine.high %v513_v8, %v517_v9  ;;  %v520_v16 = vld [vmem:[#allocation8 + $0xb40] sm:$0xff]  ;;  %v183_v1 = vld [vmem:[#allocation8 + $0xb8] sm:$0xff]  ;;  %v190_v7 = vld [vmem:[#allocation8 + $0xf0] sm:$0xff] }
 0x105   :  { %v3939_v27 = vcombine.low %v520_v16, %v524_v17 }
 0x107   :  { %2603 = vmatpush1.bf16.msra.mxu0 %v3875_v21  ;;  %2732 = vmatpush1.bf16.msra.mxu1 %v3877_v53  ;;  %v3933_v21 = vcombine.low %v513_v8, %v517_v9  ;;  %v3940_v53 = vcombine.high %v520_v16, %v524_v17  ;;  %v187_v8 = vld [vmem:[#allocation8 + $0xd8] sm:$0xff]  ;;  %v194_v16 = vld [vmem:[#allocation8 + $0x110] sm:$0xff] }
 0x108   :  { %2604 = vmatprep.subr.bf16.mxu0 %v3884_v54  ;;  %2733 = vmatprep.subr.bf16.mxu1 %v3886_v22  ;;  %v3942_v54 = vcombine.high %v521_v18, %v525_v19  ;;  %v528_v22 = vld [vmem:[#allocation8 + $0xb80] sm:$0xff]  ;;  %v191_v9 = vld [vmem:[#allocation8 + $0xf8] sm:$0xff]  ;;  %v198_v17 = vld [vmem:[#allocation8 + $0x130] sm:$0xff] }
 0x109   :  { %v3947_v13 = vcombine.low %v528_v22, %v532_v24 }
 0x10b   :  { %2605 = vmatpush1.bf16.msra.mxu0 %v3883_v30  ;;  %2734 = vmatpush1.bf16.msra.mxu1 %v3885_v32  ;;  %v3941_v30 = vcombine.low %v521_v18, %v525_v19  ;;  %v3948_v32 = vcombine.high %v528_v22, %v532_v24  ;;  %v195_v18 = vld [vmem:[#allocation8 + $0x118] sm:$0xff]  ;;  %v206_v22 = vld [vmem:[#allocation8 + $0x170] sm:$0xff] }
 0x10c   :  { %2606 = vmatprep.subr.bf16.mxu0 %v3892_v33  ;;  %2735 = vmatprep.subr.bf16.mxu1 %v3894_v34  ;;  %v3950_v33 = vcombine.high %v529_v25, %v533_v26  ;;  %v536_v34 = vld [vmem:[#allocation8 + $0xbc0] sm:$0xff]  ;;  %v199_v19 = vld [vmem:[#allocation8 + $0x138] sm:$0xff] }
 0x10d   :  { %v3955_v45 = vcombine.low %v536_v34, %v540_v35  ;;  %v203_v24 = vld [vmem:[#allocation8 + $0x158] sm:$0xff] }
 0x10f   :  { %2607 = vmatpush1.bf16.msra.mxu0 %v3891_v14  ;;  %2736 = vmatpush1.bf16.msra.mxu1 %v3893_v38  ;;  %v3949_v14 = vcombine.low %v529_v25, %v533_v26  ;;  %v3956_v38 = vcombine.high %v536_v34, %v540_v35  ;;  %v207_v25 = vld [vmem:[#allocation8 + $0x178] sm:$0xff]  ;;  %v3615_v26 = vcombine.low %v194_v16, %v198_v17  ;;  %v214_v34 = vld [vmem:[#allocation8 + $0x1b0] sm:$0xff] }
 0x110   :  { %2608 = vmatprep.subr.bf16.mxu0 %v3900_v40  ;;  %2737 = vmatprep.subr.bf16.mxu1 %v3902_v41  ;;  %v3958_v40 = vcombine.high %v537_v36, %v541_v37  ;;  %v162_v41 = vld [vmem:[#allocation8 + $0x10] sm:$0xff]  ;;  %v211_v35 = vld [vmem:[#allocation8 + $0x198] sm:$0xff] }
 0x113   :  { %2609 = vmatpush1.bf16.msra.mxu0 %v3899_v46  ;;  %2738 = vmatpush1.bf16.msra.mxu1 %v3901_v48  ;;  %v3571_v46 = vcombine.low %v4648_v28, %v4648_v28  ;;  %v3577_v48 = vcombine.low %v4650_v29, %v4650_v29  ;;  %v3585_v28 = vcombine.low %v163_v43, %v167_v44  ;;  %v223_v43 = vld [vmem:[#allocation8 + $0x1f8] sm:$0xff] }
 0x114   :  { %2610 = vmatprep.subr.bf16.mxu0 %v3908_v49  ;;  %2739 = vmatprep.subr.bf16.mxu1 %v3910_v50  ;;  %v3957_v49 = vcombine.low %v537_v36, %v541_v37  ;;  %v3584_v50 = vcombine.high %v162_v41, %v166_v42  ;;  %v215_v36 = vld [vmem:[#allocation8 + $0x1b8] sm:$0xff] }
 0x117   :  { %2611 = vmatpush1.bf16.msra.mxu0 %v3907_v57  ;;  %2740 = vmatpush1.bf16.msra.mxu1 %v3909_v58  ;;  %v175_v57 = vld [vmem:[#allocation8 + $0x78] sm:$0xff]  ;;  %v4671_v58 = vsel %vm135_vm0, %v3571_v46, %v3577_v48 }
 0x118   :  { %2612 = vmatprep.subr.bf16.mxu0 %v3916_v59  ;;  %2741 = vmatprep.subr.bf16.mxu1 %v3918_v60  ;;  %v3583_v59 = vcombine.low %v162_v41, %v166_v42  ;;  %v3592_v60 = vcombine.high %v170_v52, %v174_v55  ;;  %v3594_v29 = vcombine.high %v171_v56, %v175_v57  ;;  %v222_v41 = vld [vmem:[#allocation8 + $0x1f0] sm:$0xff]  ;;  %v219_v42 = vld [vmem:[#allocation8 + $0x1d8] sm:$0xff] }
 0x119   :  { %v3642_v48 = vcombine.high %v219_v42, %v223_v43 }
 0x11b   :  { %2613 = vmatpush1.bf16.msra.mxu0 %v3915_v2  ;;  %2742 = vmatpush1.bf16.msra.mxu1 %v3917_v3  ;;  %v3591_v2 = vcombine.low %v170_v52, %v174_v55  ;;  %v3593_v3 = vcombine.low %v171_v56, %v175_v57  ;;  %v231_v52 = vld [vmem:[#allocation8 + $0x238] sm:$0xff]  ;;  %v3641_v56 = vcombine.low %v219_v42, %v223_v43 }
 0x11c   :  { %2614 = vmatprep.subr.bf16.mxu0 %v3924_v4  ;;  %2743 = vmatprep.subr.bf16.mxu1 %v3926_v5  ;;  %v3600_v4 = vcombine.high %v178_v61, %v182_v62  ;;  %v3602_v5 = vcombine.high %v179_v0, %v183_v1 }
 0x11f   :  { %2615 = vmatpush1.bf16.msra.mxu0 %v3923_v10  ;;  %2744 = vmatpush1.bf16.msra.mxu1 %v3925_v11  ;;  %v3599_v10 = vcombine.low %v178_v61, %v182_v62  ;;  %v3601_v11 = vcombine.low %v179_v0, %v183_v1  ;;  %v239_v61 = vld [vmem:[#allocation8 + $0x278] sm:$0xff] }
 0x120   :  { %2616 = vmatprep.subr.bf16.mxu0 %v3932_v12  ;;  %2745 = vmatprep.subr.bf16.mxu1 %v3934_v15  ;;  %v3608_v12 = vcombine.high %v186_v6, %v190_v7  ;;  %v3610_v15 = vcombine.high %v187_v8, %v191_v9 }
 0x123   :  { %2617 = vmatpush1.bf16.msra.mxu0 %v3931_v20  ;;  %2746 = vmatpush1.bf16.msra.mxu1 %v3933_v21  ;;  %v3607_v20 = vcombine.low %v186_v6, %v190_v7  ;;  %v3609_v21 = vcombine.low %v187_v8, %v191_v9  ;;  %v247_v6 = vld [vmem:[#allocation8 + $0x2b8] sm:$0xff] }
 0x124   :  { %2618 = vmatprep.subr.bf16.mxu0 %v3940_v53  ;;  %2747 = vmatprep.subr.bf16.mxu1 %v3942_v54  ;;  %v3616_v53 = vcombine.high %v194_v16, %v198_v17  ;;  %v202_v54 = vld [vmem:[#allocation8 + $0x150] sm:$0xff]  ;;  %v255_v16 = vld [vmem:[#allocation8 + $0x2f8] sm:$0xff] }
 0x125   :  { %v3623_v37 = vcombine.low %v202_v54, %v206_v22 }
 0x127   :  { %2619 = vmatpush1.bf16.msra.mxu0 %v3939_v27  ;;  %2748 = vmatpush1.bf16.msra.mxu1 %v3941_v30  ;;  %v3617_v27 = vcombine.low %v195_v18, %v199_v19  ;;  %v3624_v30 = vcombine.high %v202_v54, %v206_v22  ;;  %v263_v54 = vld [vmem:[#allocation8 + $0x338] sm:$0xff] }
 0x128   :  { %2620 = vmatprep.subr.bf16.mxu0 %v3948_v32  ;;  %2749 = vmatprep.subr.bf16.mxu1 %v3950_v33  ;;  %v3626_v32 = vcombine.high %v203_v24, %v207_v25  ;;  %v210_v33 = vld [vmem:[#allocation8 + $0x190] sm:$0xff] }
 0x129   :  { %v3631_v44 = vcombine.low %v210_v33, %v214_v34 }
 0x12b   :  { %2621 = vmatpush1.bf16.msra.mxu0 %v3947_v13  ;;  %2750 = vmatpush1.bf16.msra.mxu1 %v3949_v14  ;;  %v3625_v13 = vcombine.low %v203_v24, %v207_v25  ;;  %v3632_v14 = vcombine.high %v210_v33, %v214_v34  ;;  %v271_v33 = vld [vmem:[#allocation8 + $0x378] sm:$0xff] }
 0x12c   :  { %2622 = vmatprep.subr.bf16.mxu0 %v3956_v38  ;;  %2751 = vmatprep.subr.bf16.mxu1 %v3958_v40  ;;  %v3634_v38 = vcombine.high %v211_v35, %v215_v36  ;;  %v218_v40 = vld [vmem:[#allocation8 + $0x1d0] sm:$0xff] }
 0x12d   :  { %v3640_v46 = vcombine.high %v218_v40, %v222_v41  ;;  %v3639_v55 = vcombine.low %v218_v40, %v222_v41  ;;  %v279_v40 = vld [vmem:[#allocation8 + $0x3b8] sm:$0xff] }
 0x12f   :  { %2623 = vmatpush1.bf16.msra.mxu0 %v3955_v45  ;;  %2752 = vmatpush1.bf16.msra.mxu1 %v3957_v49  ;;  %v3633_v45 = vcombine.low %v211_v35, %v215_v36  ;;  %v226_v49 = vld [vmem:[#allocation8 + $0x210] sm:$0xff] }
 0x130   :  { %2764 = vmatprep.subr.bf16.mxu0 %v3584_v50  ;;  %2893 = vmatprep.subr.bf16.mxu1 %v3586_v51  ;;  %v230_v50 = vld [vmem:[#allocation8 + $0x230] sm:$0xff]  ;;  %v227_v51 = vld [vmem:[#allocation8 + $0x218] sm:$0xff] }
 0x131   :  { %v3648_v57 = vcombine.high %v226_v49, %v230_v50  ;;  %v3647_v62 = vcombine.low %v226_v49, %v230_v50  ;;  %v3649_v0 = vcombine.low %v227_v51, %v231_v52  ;;  %v287_v49 = vld [vmem:[#allocation8 + $0x3f8] sm:$0xff] }
 0x132   :  { %2625 = vmatmul.mubr.bf16.vlgmr.msra.gmra.mrb[0].mxu0 %v4671_v58  ;;  %2754 = vmatmul.mubr.bf16.vlgmr.msra.gmra.mrb[0].mxu1 %v4671_v58 }
 0x133   :  { %2765 = vmatpush1.bf16.msra.mxu0 %v3583_v59  ;;  %2894 = vmatpush1.bf16.msra.mxu1 %v3585_v28  ;;  %v3650_v59 = vcombine.high %v227_v51, %v231_v52  ;;  %v234_v28 = vld [vmem:[#allocation8 + $0x250] sm:$0xff] }
 0x134   :  { %2766 = vmatprep.subr.bf16.mxu0 %v3592_v60  ;;  %2895 = vmatprep.subr.bf16.mxu1 %v3594_v29  ;;  %v238_v60 = vld [vmem:[#allocation8 + $0x270] sm:$0xff]  ;;  %v235_v29 = vld [vmem:[#allocation8 + $0x258] sm:$0xff] }
 0x135   :  { %2796 = vmatprep.mubr.bf16.mxu0 %v4618_v63  ;;  %2925 = vmatprep.mubr.bf16.mxu1 %v4618_v63  ;;  %v3618_v63 = vcombine.high %v195_v18, %v199_v19  ;;  %v3656_v1 = vcombine.high %v234_v28, %v238_v60  ;;  %v3655_v7 = vcombine.low %v234_v28, %v238_v60  ;;  %v295_v28 = vld [vmem:[#allocation8 + $0x438] sm:$0xff] }
 0x136   :  { %v3657_v8 = vcombine.low %v235_v29, %v239_v61 }
 0x137   :  { %2767 = vmatpush1.bf16.msra.mxu0 %v3591_v2  ;;  %2896 = vmatpush1.bf16.msra.mxu1 %v3593_v3  ;;  %v3658_v2 = vcombine.high %v235_v29, %v239_v61  ;;  %v242_v3 = vld [vmem:[#allocation8 + $0x290] sm:$0xff] }
 0x138   :  { %2768 = vmatprep.subr.bf16.mxu0 %v3600_v4  ;;  %2897 = vmatprep.subr.bf16.mxu1 %v3602_v5  ;;  %v246_v4 = vld [vmem:[#allocation8 + $0x2b0] sm:$0xff]  ;;  %v243_v5 = vld [vmem:[#allocation8 + $0x298] sm:$0xff] }
 0x139   :  { %v3664_v9 = vcombine.high %v242_v3, %v246_v4  ;;  %v3663_v17 = vcombine.low %v242_v3, %v246_v4  ;;  %v3665_v18 = vcombine.low %v243_v5, %v247_v6  ;;  %v303_v3 = vld [vmem:[#allocation8 + $0x478] sm:$0xff] }
 0x13b   :  { %2769 = vmatpush1.bf16.msra.mxu0 %v3599_v10  ;;  %2898 = vmatpush1.bf16.msra.mxu1 %v3601_v11  ;;  %v3666_v10 = vcombine.high %v243_v5, %v247_v6  ;;  %v250_v11 = vld [vmem:[#allocation8 + $0x2d0] sm:$0xff] }
 0x13c   :  { %2770 = vmatprep.subr.bf16.mxu0 %v3608_v12  ;;  %2899 = vmatprep.subr.bf16.mxu1 %v3610_v15  ;;  %v254_v12 = vld [vmem:[#allocation8 + $0x2f0] sm:$0xff]  ;;  %v251_v15 = vld [vmem:[#allocation8 + $0x2d8] sm:$0xff] }
 0x13d   :  { %v3672_v19 = vcombine.high %v250_v11, %v254_v12  ;;  %v3671_v22 = vcombine.low %v250_v11, %v254_v12  ;;  %v3673_v24 = vcombine.low %v251_v15, %v255_v16  ;;  %v311_v11 = vld [vmem:[#allocation8 + $0x4b8] sm:$0xff] }
 0x13f   :  { %2771 = vmatpush1.bf16.msra.mxu0 %v3607_v20  ;;  %2900 = vmatpush1.bf16.msra.mxu1 %v3609_v21  ;;  %v3674_v20 = vcombine.high %v251_v15, %v255_v16  ;;  %v258_v21 = vld [vmem:[#allocation8 + $0x310] sm:$0xff] }
 0x140   :  { %2772 = vmatprep.subr.bf16.mxu0 %v3616_v53  ;;  %2901 = vmatprep.subr.bf16.mxu1 %v3618_v63  ;;  %v262_v53 = vld [vmem:[#allocation8 + $0x330] sm:$0xff]  ;;  %v259_v63 = vld [vmem:[#allocation8 + $0x318] sm:$0xff] }
 0x141   :  { %v3680_v25 = vcombine.high %v258_v21, %v262_v53  ;;  %v3679_v34 = vcombine.low %v258_v21, %v262_v53  ;;  %v3681_v35 = vcombine.low %v259_v63, %v263_v54  ;;  %v319_v21 = vld [vmem:[#allocation8 + $0x4f8] sm:$0xff] }
 0x143   :  { %2773 = vmatpush1.bf16.msra.mxu0 %v3615_v26  ;;  %2902 = vmatpush1.bf16.msra.mxu1 %v3617_v27  ;;  %v3682_v26 = vcombine.high %v259_v63, %v263_v54  ;;  %v266_v27 = vld [vmem:[#allocation8 + $0x350] sm:$0xff] }
 0x144   :  { %2774 = vmatprep.subr.bf16.mxu0 %v3624_v30  ;;  %2903 = vmatprep.subr.bf16.mxu1 %v3626_v32  ;;  %v270_v30 = vld [vmem:[#allocation8 + $0x370] sm:$0xff]  ;;  %v267_v32 = vld [vmem:[#allocation8 + $0x358] sm:$0xff] }
 0x145   :  { %v3688_v36 = vcombine.high %v266_v27, %v270_v30  ;;  %v3687_v41 = vcombine.low %v266_v27, %v270_v30  ;;  %v3689_v42 = vcombine.low %v267_v32, %v271_v33 }
 0x147   :  { %2775 = vmatpush1.bf16.msra.mxu0 %v3623_v37  ;;  %2904 = vmatpush1.bf16.msra.mxu1 %v3625_v13  ;;  %v3690_v37 = vcombine.high %v267_v32, %v271_v33  ;;  %v274_v13 = vld [vmem:[#allocation8 + $0x390] sm:$0xff] }
 0x148   :  { %2776 = vmatprep.subr.bf16.mxu0 %v3632_v14  ;;  %2905 = vmatprep.subr.bf16.mxu1 %v3634_v38  ;;  %v278_v14 = vld [vmem:[#allocation8 + $0x3b0] sm:$0xff]  ;;  %v275_v38 = vld [vmem:[#allocation8 + $0x398] sm:$0xff] }
 0x149   :  { %v3696_v43 = vcombine.high %v274_v13, %v278_v14  ;;  %v3695_v50 = vcombine.low %v274_v13, %v278_v14  ;;  %v3697_v51 = vcombine.low %v275_v38, %v279_v40  ;;  %v330_v33 = vld [vmem:[#allocation8 + $0x550] sm:$0xff] }
 0x14b   :  { %2777 = vmatpush1.bf16.msra.mxu0 %v3631_v44  ;;  %2906 = vmatpush1.bf16.msra.mxu1 %v3633_v45  ;;  %v3698_v44 = vcombine.high %v275_v38, %v279_v40  ;;  %v282_v45 = vld [vmem:[#allocation8 + $0x3d0] sm:$0xff] }
 0x14c   :  { %2778 = vmatprep.subr.bf16.mxu0 %v3640_v46  ;;  %2907 = vmatprep.subr.bf16.mxu1 %v3642_v48  ;;  %v286_v46 = vld [vmem:[#allocation8 + $0x3f0] sm:$0xff]  ;;  %v283_v48 = vld [vmem:[#allocation8 + $0x3d8] sm:$0xff] }
 0x14d   :  { %v3704_v52 = vcombine.high %v282_v45, %v286_v46  ;;  %v3703_v60 = vcombine.low %v282_v45, %v286_v46  ;;  %v3705_v29 = vcombine.low %v283_v48, %v287_v49  ;;  %v338_v40 = vld [vmem:[#allocation8 + $0x590] sm:$0xff] }
 0x14f   :  { %2779 = vmatpush1.bf16.msra.mxu0 %v3639_v55  ;;  %2908 = vmatpush1.bf16.msra.mxu1 %v3641_v56  ;;  %v3706_v55 = vcombine.high %v283_v48, %v287_v49  ;;  %v290_v56 = vld [vmem:[#allocation8 + $0x410] sm:$0xff] }
 0x150   :  { %2780 = vmatprep.subr.bf16.mxu0 %v3648_v57  ;;  %2909 = vmatprep.subr.bf16.mxu1 %v3650_v59  ;;  %v294_v57 = vld [vmem:[#allocation8 + $0x430] sm:$0xff]  ;;  %v291_v59 = vld [vmem:[#allocation8 + $0x418] sm:$0xff] }
 0x151   :  { %v3712_v61 = vcombine.high %v290_v56, %v294_v57  ;;  %v3711_v4 = vcombine.low %v290_v56, %v294_v57  ;;  %v3713_v5 = vcombine.low %v291_v59, %v295_v28  ;;  %v346_v49 = vld [vmem:[#allocation8 + $0x5d0] sm:$0xff] }
 0x153   :  { %2781 = vmatpush1.bf16.msra.mxu0 %v3647_v62  ;;  %2910 = vmatpush1.bf16.msra.mxu1 %v3649_v0  ;;  %v3714_v62 = vcombine.high %v291_v59, %v295_v28  ;;  %v298_v0 = vld [vmem:[#allocation8 + $0x450] sm:$0xff] }
 0x154   :  { %2782 = vmatprep.subr.bf16.mxu0 %v3656_v1  ;;  %2911 = vmatprep.subr.bf16.mxu1 %v3658_v2  ;;  %v302_v1 = vld [vmem:[#allocation8 + $0x470] sm:$0xff]  ;;  %v299_v2 = vld [vmem:[#allocation8 + $0x458] sm:$0xff] }
 0x155   :  { %v3720_v6 = vcombine.high %v298_v0, %v302_v1  ;;  %v3719_v12 = vcombine.low %v298_v0, %v302_v1  ;;  %v3721_v15 = vcombine.low %v299_v2, %v303_v3  ;;  %v354_v28 = vld [vmem:[#allocation8 + $0x610] sm:$0xff] }
 0x157   :  { %2783 = vmatpush1.bf16.msra.mxu0 %v3655_v7  ;;  %2912 = vmatpush1.bf16.msra.mxu1 %v3657_v8  ;;  %v3722_v7 = vcombine.high %v299_v2, %v303_v3  ;;  %v306_v8 = vld [vmem:[#allocation8 + $0x490] sm:$0xff] }
 0x158   :  { %2784 = vmatprep.subr.bf16.mxu0 %v3664_v9  ;;  %2913 = vmatprep.subr.bf16.mxu1 %v3666_v10  ;;  %v310_v9 = vld [vmem:[#allocation8 + $0x4b0] sm:$0xff]  ;;  %v307_v10 = vld [vmem:[#allocation8 + $0x498] sm:$0xff] }
 0x159   :  { %v3728_v16 = vcombine.high %v306_v8, %v310_v9  ;;  %v3727_v53 = vcombine.low %v306_v8, %v310_v9  ;;  %v362_v3 = vld [vmem:[#allocation8 + $0x650] sm:$0xff] }
 0x15b   :  { %2785 = vmatpush1.bf16.msra.mxu0 %v3663_v17  ;;  %2914 = vmatpush1.bf16.msra.mxu1 %v3665_v18  ;;  %v3730_v17 = vcombine.high %v307_v10, %v311_v11  ;;  %v314_v18 = vld [vmem:[#allocation8 + $0x4d0] sm:$0xff] }
 0x15c   :  { %2786 = vmatprep.subr.bf16.mxu0 %v3672_v19  ;;  %2915 = vmatprep.subr.bf16.mxu1 %v3674_v20  ;;  %v318_v19 = vld [vmem:[#allocation8 + $0x4f0] sm:$0xff]  ;;  %v315_v20 = vld [vmem:[#allocation8 + $0x4d8] sm:$0xff] }
 0x15d   :  { %v3736_v63 = vcombine.high %v314_v18, %v318_v19  ;;  %v3738_v54 = vcombine.high %v315_v20, %v319_v21  ;;  %v3735_v27 = vcombine.low %v314_v18, %v318_v19  ;;  %v3737_v30 = vcombine.low %v315_v20, %v319_v21  ;;  %v378_v21 = vld [vmem:[#allocation8 + $0x6d0] sm:$0xff] }
 0x15f   :  { %2787 = vmatpush1.bf16.msra.mxu0 %v3671_v22  ;;  %2916 = vmatpush1.bf16.msra.mxu1 %v3673_v24  ;;  %v322_v22 = vld [vmem:[#allocation8 + $0x510] sm:$0xff] }
 0x160   :  { %2788 = vmatprep.subr.bf16.mxu0 %v3680_v25  ;;  %2917 = vmatprep.subr.bf16.mxu1 %v3682_v26  ;;  %v326_v24 = vld [vmem:[#allocation8 + $0x530] sm:$0xff]  ;;  %v323_v25 = vld [vmem:[#allocation8 + $0x518] sm:$0xff] }
 0x161   :  { %v327_v26 = vld [vmem:[#allocation8 + $0x538] sm:$0xff]  ;;  %v3744_v32 = vcombine.high %v322_v22, %v326_v24 }
 0x162   :  { %v3745_v13 = vcombine.low %v323_v25, %v327_v26 }
 0x163   :  { %2789 = vmatpush1.bf16.msra.mxu0 %v3679_v34  ;;  %2918 = vmatpush1.bf16.msra.mxu1 %v3681_v35  ;;  %v334_v34 = vld [vmem:[#allocation8 + $0x570] sm:$0xff]  ;;  %v331_v35 = vld [vmem:[#allocation8 + $0x558] sm:$0xff] }
 0x164   :  { %2790 = vmatprep.subr.bf16.mxu0 %v3688_v36  ;;  %2919 = vmatprep.subr.bf16.mxu1 %v3690_v37  ;;  %v335_v36 = vld [vmem:[#allocation8 + $0x578] sm:$0xff]  ;;  %v3743_v37 = vcombine.low %v322_v22, %v326_v24  ;;  %v3752_v14 = vcombine.high %v330_v33, %v334_v34 }
 0x165   :  { %v3754_v38 = vcombine.high %v331_v35, %v335_v36  ;;  %v3753_v45 = vcombine.low %v331_v35, %v335_v36  ;;  %v394_v36 = vld [vmem:[#allocation8 + $0x750] sm:$0xff] }
 0x167   :  { %2791 = vmatpush1.bf16.msra.mxu0 %v3687_v41  ;;  %2920 = vmatpush1.bf16.msra.mxu1 %v3689_v42  ;;  %v342_v41 = vld [vmem:[#allocation8 + $0x5b0] sm:$0xff]  ;;  %v339_v42 = vld [vmem:[#allocation8 + $0x598] sm:$0xff] }
 0x168   :  { %2792 = vmatprep.subr.bf16.mxu0 %v3696_v43  ;;  %2921 = vmatprep.subr.bf16.mxu1 %v3698_v44  ;;  %v343_v43 = vld [vmem:[#allocation8 + $0x5b8] sm:$0xff]  ;;  %v3751_v44 = vcombine.low %v330_v33, %v334_v34  ;;  %v3760_v46 = vcombine.high %v338_v40, %v342_v41 }
 0x169   :  { %v3762_v48 = vcombine.high %v339_v42, %v343_v43  ;;  %v3761_v56 = vcombine.low %v339_v42, %v343_v43  ;;  %v402_v43 = vld [vmem:[#allocation8 + $0x790] sm:$0xff] }
 0x16b   :  { %2793 = vmatpush1.bf16.msra.mxu0 %v3695_v50  ;;  %2922 = vmatpush1.bf16.msra.mxu1 %v3697_v51  ;;  %v350_v50 = vld [vmem:[#allocation8 + $0x5f0] sm:$0xff]  ;;  %v347_v51 = vld [vmem:[#allocation8 + $0x5d8] sm:$0xff] }
 0x16c   :  { %2794 = vmatprep.subr.bf16.mxu0 %v3704_v52  ;;  %2923 = vmatprep.subr.bf16.mxu1 %v3706_v55  ;;  %v351_v52 = vld [vmem:[#allocation8 + $0x5f8] sm:$0xff]  ;;  %v3759_v55 = vcombine.low %v338_v40, %v342_v41  ;;  %v3768_v57 = vcombine.high %v346_v49, %v350_v50 }
 0x16d   :  { %v3770_v59 = vcombine.high %v347_v51, %v351_v52  ;;  %v3769_v0 = vcombine.low %v347_v51, %v351_v52  ;;  %v410_v52 = vld [vmem:[#allocation8 + $0x7d0] sm:$0xff] }
 0x16f   :  { %2795 = vmatpush1.bf16.msra.mxu0 %v3703_v60  ;;  %2924 = vmatpush1.bf16.msra.mxu1 %v3705_v29  ;;  %v358_v60 = vld [vmem:[#allocation8 + $0x630] sm:$0xff]  ;;  %v355_v29 = vld [vmem:[#allocation8 + $0x618] sm:$0xff] }
 0x170   :  { %2807 = vmatprep.subr.bf16.mxu0 %v3712_v61  ;;  %2936 = vmatprep.subr.bf16.mxu1 %v3714_v62  ;;  %v359_v61 = vld [vmem:[#allocation8 + $0x638] sm:$0xff]  ;;  %v3767_v62 = vcombine.low %v346_v49, %v350_v50  ;;  %v3776_v1 = vcombine.high %v354_v28, %v358_v60 }
 0x171   :  { %v3778_v2 = vcombine.high %v355_v29, %v359_v61  ;;  %v3777_v8 = vcombine.low %v355_v29, %v359_v61  ;;  %v418_v61 = vld [vmem:[#allocation8 + $0x810] sm:$0xff] }
 0x172   :  { %2797 = vmatmul.mubr.bf16.vlgmr.msra.gmra.mrb[4].mxu0 %v4635_v23  ;;  %2926 = vmatmul.mubr.bf16.vlgmr.msra.gmra.mrb[4].mxu1 %v4635_v23  ;;  %v3729_v23 = vcombine.low %v307_v10, %v311_v11  ;;  %v370_v11 = vld [vmem:[#allocation8 + $0x690] sm:$0xff] }
 0x173   :  { %2808 = vmatpush1.bf16.msra.mxu0 %v3711_v4  ;;  %2937 = vmatpush1.bf16.msra.mxu1 %v3713_v5  ;;  %v366_v4 = vld [vmem:[#allocation8 + $0x670] sm:$0xff]  ;;  %v363_v5 = vld [vmem:[#allocation8 + $0x658] sm:$0xff] }
 0x174   :  { %2809 = vmatprep.subr.bf16.mxu0 %v3720_v6  ;;  %2938 = vmatprep.subr.bf16.mxu1 %v3722_v7  ;;  %v367_v6 = vld [vmem:[#allocation8 + $0x678] sm:$0xff]  ;;  %v3775_v7 = vcombine.low %v354_v28, %v358_v60  ;;  %v3784_v9 = vcombine.high %v362_v3, %v366_v4 }
 0x175   :  { %2839 = vmatprep.mubr.bf16.mxu0 %v4639_v31  ;;  %2968 = vmatprep.mubr.bf16.mxu1 %v4639_v31  ;;  %v3746_v31 = vcombine.high %v323_v25, %v327_v26  ;;  %v3786_v10 = vcombine.high %v363_v5, %v367_v6  ;;  %v3785_v18 = vcombine.low %v363_v5, %v367_v6  ;;  %v386_v26 = vld [vmem:[#allocation8 + $0x710] sm:$0xff] }
 0x176   :  { %v426_v6 = vld [vmem:[#allocation8 + $0x850] sm:$0xff] }
 0x177   :  { %2810 = vmatpush1.bf16.msra.mxu0 %v3719_v12  ;;  %2939 = vmatpush1.bf16.msra.mxu1 %v3721_v15  ;;  %v374_v12 = vld [vmem:[#allocation8 + $0x6b0] sm:$0xff]  ;;  %v371_v15 = vld [vmem:[#allocation8 + $0x698] sm:$0xff] }
 0x178   :  { %2811 = vmatprep.subr.bf16.mxu0 %v3728_v16  ;;  %2940 = vmatprep.subr.bf16.mxu1 %v3730_v17  ;;  %v375_v16 = vld [vmem:[#allocation8 + $0x6b8] sm:$0xff]  ;;  %v3783_v17 = vcombine.low %v362_v3, %v366_v4  ;;  %v3792_v19 = vcombine.high %v370_v11, %v374_v12 }
 0x179   :  { %v3794_v20 = vcombine.high %v371_v15, %v375_v16  ;;  %v3793_v22 = vcombine.low %v371_v15, %v375_v16  ;;  %v434_v16 = vld [vmem:[#allocation8 + $0x890] sm:$0xff] }
 0x17b   :  { %2812 = vmatpush1.bf16.msra.mxu0 %v3727_v53  ;;  %2941 = vmatpush1.bf16.msra.mxu1 %v3729_v23  ;;  %v382_v53 = vld [vmem:[#allocation8 + $0x6f0] sm:$0xff]  ;;  %v379_v23 = vld [vmem:[#allocation8 + $0x6d8] sm:$0xff] }
 0x17c   :  { %2813 = vmatprep.subr.bf16.mxu0 %v3736_v63  ;;  %2942 = vmatprep.subr.bf16.mxu1 %v3738_v54  ;;  %v383_v63 = vld [vmem:[#allocation8 + $0x6f8] sm:$0xff]  ;;  %v3791_v54 = vcombine.low %v370_v11, %v374_v12  ;;  %v3800_v24 = vcombine.high %v378_v21, %v382_v53 }
 0x17d   :  { %v3802_v25 = vcombine.high %v379_v23, %v383_v63  ;;  %v3801_v33 = vcombine.low %v379_v23, %v383_v63  ;;  %v442_v63 = vld [vmem:[#allocation8 + $0x8d0] sm:$0xff] }
 0x17f   :  { %2814 = vmatpush1.bf16.msra.mxu0 %v3735_v27  ;;  %2943 = vmatpush1.bf16.msra.mxu1 %v3737_v30  ;;  %v390_v27 = vld [vmem:[#allocation8 + $0x730] sm:$0xff]  ;;  %v387_v30 = vld [vmem:[#allocation8 + $0x718] sm:$0xff] }
 0x180   :  { %2815 = vmatprep.subr.bf16.mxu0 %v3744_v32  ;;  %2944 = vmatprep.subr.bf16.mxu1 %v3746_v31  ;;  %v391_v32 = vld [vmem:[#allocation8 + $0x738] sm:$0xff]  ;;  %v3799_v31 = vcombine.low %v378_v21, %v382_v53  ;;  %v3808_v34 = vcombine.high %v386_v26, %v390_v27 }
 0x181   :  { %v3810_v35 = vcombine.high %v387_v30, %v391_v32  ;;  %v3809_v40 = vcombine.low %v387_v30, %v391_v32  ;;  %v450_v30 = vld [vmem:[#allocation8 + $0x910] sm:$0xff] }
 0x182   :  { %v454_v32 = vld [vmem:[#allocation8 + $0x930] sm:$0xff] }
 0x183   :  { %2816 = vmatpush1.bf16.msra.mxu0 %v3743_v37  ;;  %2945 = vmatpush1.bf16.msra.mxu1 %v3745_v13  ;;  %v398_v37 = vld [vmem:[#allocation8 + $0x770] sm:$0xff]  ;;  %v395_v13 = vld [vmem:[#allocation8 + $0x758] sm:$0xff] }
 0x184   :  { %2817 = vmatprep.subr.bf16.mxu0 %v3752_v14  ;;  %2946 = vmatprep.subr.bf16.mxu1 %v3754_v38  ;;  %v399_v14 = vld [vmem:[#allocation8 + $0x778] sm:$0xff]  ;;  %v3807_v38 = vcombine.low %v386_v26, %v390_v27  ;;  %v3816_v41 = vcombine.high %v394_v36, %v398_v37 }
 0x185   :  { %v3818_v42 = vcombine.high %v395_v13, %v399_v14  ;;  %v3817_v49 = vcombine.low %v395_v13, %v399_v14  ;;  %v462_v13 = vld [vmem:[#allocation8 + $0x970] sm:$0xff]  ;;  %v459_v14 = vld [vmem:[#allocation8 + $0x958] sm:$0xff] }
 0x187   :  { %2818 = vmatpush1.bf16.msra.mxu0 %v3751_v44  ;;  %2947 = vmatpush1.bf16.msra.mxu1 %v3753_v45  ;;  %v406_v44 = vld [vmem:[#allocation8 + $0x7b0] sm:$0xff]  ;;  %v403_v45 = vld [vmem:[#allocation8 + $0x798] sm:$0xff] }
 0x188   :  { %2819 = vmatprep.subr.bf16.mxu0 %v3760_v46  ;;  %2948 = vmatprep.subr.bf16.mxu1 %v3762_v48  ;;  %v407_v46 = vld [vmem:[#allocation8 + $0x7b8] sm:$0xff]  ;;  %v3815_v48 = vcombine.low %v394_v36, %v398_v37  ;;  %v3824_v50 = vcombine.high %v402_v43, %v406_v44  ;;  %v3872_v36 = vcombine.high %v450_v30, %v454_v32  ;;  %v458_v37 = vld [vmem:[#allocation8 + $0x950] sm:$0xff] }
 0x189   :  { %v3826_v51 = vcombine.high %v403_v45, %v407_v46  ;;  %v3825_v28 = vcombine.low %v403_v45, %v407_v46  ;;  %v470_v45 = vld [vmem:[#allocation8 + $0x9b0] sm:$0xff]  ;;  %v467_v46 = vld [vmem:[#allocation8 + $0x998] sm:$0xff] }
 0x18b   :  { %2820 = vmatpush1.bf16.msra.mxu0 %v3759_v55  ;;  %2949 = vmatpush1.bf16.msra.mxu1 %v3761_v56  ;;  %v414_v55 = vld [vmem:[#allocation8 + $0x7f0] sm:$0xff]  ;;  %v411_v56 = vld [vmem:[#allocation8 + $0x7d8] sm:$0xff] }
 0x18c   :  { %2821 = vmatprep.subr.bf16.mxu0 %v3768_v57  ;;  %2950 = vmatprep.subr.bf16.mxu1 %v3770_v59  ;;  %v415_v57 = vld [vmem:[#allocation8 + $0x7f8] sm:$0xff]  ;;  %v3823_v59 = vcombine.low %v402_v43, %v406_v44  ;;  %v3832_v60 = vcombine.high %v410_v52, %v414_v55  ;;  %v466_v44 = vld [vmem:[#allocation8 + $0x990] sm:$0xff] }
 0x18d   :  { %v3834_v29 = vcombine.high %v411_v56, %v415_v57  ;;  %v3833_v3 = vcombine.low %v411_v56, %v415_v57  ;;  %v478_v56 = vld [vmem:[#allocation8 + $0x9f0] sm:$0xff]  ;;  %v475_v57 = vld [vmem:[#allocation8 + $0x9d8] sm:$0xff] }
 0x18f   :  { %2822 = vmatpush1.bf16.msra.mxu0 %v3767_v62  ;;  %2951 = vmatpush1.bf16.msra.mxu1 %v3769_v0  ;;  %v422_v62 = vld [vmem:[#allocation8 + $0x830] sm:$0xff]  ;;  %v419_v0 = vld [vmem:[#allocation8 + $0x818] sm:$0xff] }
 0x190   :  { %2823 = vmatprep.subr.bf16.mxu0 %v3776_v1  ;;  %2952 = vmatprep.subr.bf16.mxu1 %v3778_v2  ;;  %v423_v1 = vld [vmem:[#allocation8 + $0x838] sm:$0xff]  ;;  %v3831_v2 = vcombine.low %v410_v52, %v414_v55  ;;  %v3840_v4 = vcombine.high %v418_v61, %v422_v62  ;;  %v474_v55 = vld [vmem:[#allocation8 + $0x9d0] sm:$0xff] }
 0x191   :  { %v3842_v5 = vcombine.high %v419_v0, %v423_v1  ;;  %v3841_v11 = vcombine.low %v419_v0, %v423_v1  ;;  %v486_v0 = vld [vmem:[#allocation8 + $0xa30] sm:$0xff]  ;;  %v483_v1 = vld [vmem:[#allocation8 + $0xa18] sm:$0xff] }
 0x193   :  { %2824 = vmatpush1.bf16.msra.mxu0 %v3775_v7  ;;  %2953 = vmatpush1.bf16.msra.mxu1 %v3777_v8  ;;  %v430_v7 = vld [vmem:[#allocation8 + $0x870] sm:$0xff]  ;;  %v427_v8 = vld [vmem:[#allocation8 + $0x858] sm:$0xff] }
 0x194   :  { %2825 = vmatprep.subr.bf16.mxu0 %v3784_v9  ;;  %2954 = vmatprep.subr.bf16.mxu1 %v3786_v10  ;;  %v431_v9 = vld [vmem:[#allocation8 + $0x878] sm:$0xff]  ;;  %v3839_v10 = vcombine.low %v418_v61, %v422_v62  ;;  %v3848_v12 = vcombine.high %v426_v6, %v430_v7  ;;  %v482_v62 = vld [vmem:[#allocation8 + $0xa10] sm:$0xff] }
 0x195   :  { %v3850_v15 = vcombine.high %v427_v8, %v431_v9  ;;  %v3849_v21 = vcombine.low %v427_v8, %v431_v9  ;;  %v494_v8 = vld [vmem:[#allocation8 + $0xa70] sm:$0xff]  ;;  %v491_v9 = vld [vmem:[#allocation8 + $0xa58] sm:$0xff] }
 0x197   :  { %2826 = vmatpush1.bf16.msra.mxu0 %v3783_v17  ;;  %2955 = vmatpush1.bf16.msra.mxu1 %v3785_v18  ;;  %v438_v17 = vld [vmem:[#allocation8 + $0x8b0] sm:$0xff]  ;;  %v435_v18 = vld [vmem:[#allocation8 + $0x898] sm:$0xff] }
 0x198   :  { %2827 = vmatprep.subr.bf16.mxu0 %v3792_v19  ;;  %2956 = vmatprep.subr.bf16.mxu1 %v3794_v20  ;;  %v439_v19 = vld [vmem:[#allocation8 + $0x8b8] sm:$0xff]  ;;  %v3847_v20 = vcombine.low %v426_v6, %v430_v7  ;;  %v3856_v53 = vcombine.high %v434_v16, %v438_v17  ;;  %v490_v7 = vld [vmem:[#allocation8 + $0xa50] sm:$0xff] }
 0x199   :  { %v3858_v23 = vcombine.high %v435_v18, %v439_v19 }
 0x19b   :  { %2828 = vmatpush1.bf16.msra.mxu0 %v3791_v54  ;;  %2957 = vmatpush1.bf16.msra.mxu1 %v3793_v22  ;;  %v446_v54 = vld [vmem:[#allocation8 + $0x8f0] sm:$0xff]  ;;  %v443_v22 = vld [vmem:[#allocation8 + $0x8d8] sm:$0xff] }
 0x19c   :  { %2829 = vmatprep.subr.bf16.mxu0 %v3800_v24  ;;  %2958 = vmatprep.subr.bf16.mxu1 %v3802_v25  ;;  %v447_v24 = vld [vmem:[#allocation8 + $0x8f8] sm:$0xff]  ;;  %v3855_v25 = vcombine.low %v434_v16, %v438_v17  ;;  %v3864_v26 = vcombine.high %v442_v63, %v446_v54  ;;  %v498_v17 = vld [vmem:[#allocation8 + $0xa90] sm:$0xff] }
 0x19d   :  { %v3866_v27 = vcombine.high %v443_v22, %v447_v24 }
 0x19f   :  { %2830 = vmatpush1.bf16.msra.mxu0 %v3799_v31  ;;  %2959 = vmatpush1.bf16.msra.mxu1 %v3801_v33  ;;  %v451_v31 = vld [vmem:[#allocation8 + $0x918] sm:$0xff] }
 0x1a0   :  { %2831 = vmatprep.subr.bf16.mxu0 %v3808_v34  ;;  %2960 = vmatprep.subr.bf16.mxu1 %v3810_v35  ;;  %v455_v33 = vld [vmem:[#allocation8 + $0x938] sm:$0xff]  ;;  %v3863_v34 = vcombine.low %v442_v63, %v446_v54  ;;  %v3865_v35 = vcombine.low %v443_v22, %v447_v24  ;;  %v506_v54 = vld [vmem:[#allocation8 + $0xad0] sm:$0xff] }
 0x1a1   :  { %v510_v22 = vld [vmem:[#allocation8 + $0xaf0] sm:$0xff]  ;;  %v507_v24 = vld [vmem:[#allocation8 + $0xad8] sm:$0xff] }
 0x1a3   :  { %2832 = vmatpush1.bf16.msra.mxu0 %v3807_v38  ;;  %2961 = vmatpush1.bf16.msra.mxu1 %v3809_v40  ;;  %v463_v38 = vld [vmem:[#allocation8 + $0x978] sm:$0xff]  ;;  %v3871_v40 = vcombine.low %v450_v30, %v454_v32  ;;  %v514_v32 = vld [vmem:[#allocation8 + $0xb10] sm:$0xff] }
 0x1a4   :  { %2833 = vmatprep.subr.bf16.mxu0 %v3816_v41  ;;  %2962 = vmatprep.subr.bf16.mxu1 %v3818_v42  ;;  %v3873_v41 = vcombine.low %v451_v31, %v455_v33  ;;  %v3880_v42 = vcombine.high %v458_v37, %v462_v13  ;;  %v3882_v43 = vcombine.high %v459_v14, %v463_v38 }
 0x1a7   :  { %2834 = vmatpush1.bf16.msra.mxu0 %v3815_v48  ;;  %2963 = vmatpush1.bf16.msra.mxu1 %v3817_v49  ;;  %v471_v48 = vld [vmem:[#allocation8 + $0x9b8] sm:$0xff]  ;;  %v3879_v49 = vcombine.low %v458_v37, %v462_v13  ;;  %v522_v13 = vld [vmem:[#allocation8 + $0xb50] sm:$0xff] }
 0x1a8   :  { %2835 = vmatprep.subr.bf16.mxu0 %v3824_v50  ;;  %2964 = vmatprep.subr.bf16.mxu1 %v3826_v51  ;;  %v3881_v50 = vcombine.low %v459_v14, %v463_v38  ;;  %v3888_v51 = vcombine.high %v466_v44, %v470_v45  ;;  %v3890_v52 = vcombine.high %v467_v46, %v471_v48  ;;  %v526_v14 = vld [vmem:[#allocation8 + $0xb70] sm:$0xff]  ;;  %v523_v38 = vld [vmem:[#allocation8 + $0xb58] sm:$0xff] }
 0x1ab   :  { %2836 = vmatpush1.bf16.msra.mxu0 %v3823_v59  ;;  %2965 = vmatpush1.bf16.msra.mxu1 %v3825_v28  ;;  %v479_v59 = vld [vmem:[#allocation8 + $0x9f8] sm:$0xff]  ;;  %v3887_v28 = vcombine.low %v466_v44, %v470_v45  ;;  %v530_v45 = vld [vmem:[#allocation8 + $0xb90] sm:$0xff] }
 0x1ac   :  { %2837 = vmatprep.subr.bf16.mxu0 %v3832_v60  ;;  %2966 = vmatprep.subr.bf16.mxu1 %v3834_v29  ;;  %v3889_v60 = vcombine.low %v467_v46, %v471_v48  ;;  %v3896_v29 = vcombine.high %v474_v55, %v478_v56  ;;  %v3898_v61 = vcombine.high %v475_v57, %v479_v59  ;;  %v534_v46 = vld [vmem:[#allocation8 + $0xbb0] sm:$0xff]  ;;  %v531_v48 = vld [vmem:[#allocation8 + $0xb98] sm:$0xff] }
 0x1af   :  { %2838 = vmatpush1.bf16.msra.mxu0 %v3831_v2  ;;  %2967 = vmatpush1.bf16.msra.mxu1 %v3833_v3  ;;  %v487_v2 = vld [vmem:[#allocation8 + $0xa38] sm:$0xff]  ;;  %v3895_v3 = vcombine.low %v474_v55, %v478_v56  ;;  %v538_v56 = vld [vmem:[#allocation8 + $0xbd0] sm:$0xff] }
 0x1b0   :  { %2850 = vmatprep.subr.bf16.mxu0 %v3840_v4  ;;  %2979 = vmatprep.subr.bf16.mxu1 %v3842_v5  ;;  %v3897_v4 = vcombine.low %v475_v57, %v479_v59  ;;  %v3904_v5 = vcombine.high %v482_v62, %v486_v0  ;;  %v3906_v6 = vcombine.high %v483_v1, %v487_v2  ;;  %v542_v57 = vld [vmem:[#allocation8 + $0xbf0] sm:$0xff]  ;;  %v539_v59 = vld [vmem:[#allocation8 + $0xbd8] sm:$0xff] }
 0x1b2   :  { %2840 = vmatmul.mubr.bf16.vlgmr.msra.gmra.mrb[4].mxu0 %v4657_v39  ;;  %2969 = vmatmul.mubr.bf16.vlgmr.msra.gmra.mrb[4].mxu1 %v4657_v39  ;;  %v3857_v39 = vcombine.low %v435_v18, %v439_v19  ;;  %v502_v18 = vld [vmem:[#allocation8 + $0xab0] sm:$0xff]  ;;  %v499_v19 = vld [vmem:[#allocation8 + $0xa98] sm:$0xff] }
 0x1b3   :  { %2851 = vmatpush1.bf16.msra.mxu0 %v3839_v10  ;;  %2980 = vmatpush1.bf16.msra.mxu1 %v3841_v11  ;;  %v495_v10 = vld [vmem:[#allocation8 + $0xa78] sm:$0xff]  ;;  %v3903_v11 = vcombine.low %v482_v62, %v486_v0  ;;  %v3070_v0 = vld [vmem:[%s5109_s5 + $0x80] sm:$0xff] }
 0x1b4   :  { %2852 = vmatprep.subr.bf16.mxu0 %v3848_v12  ;;  %2981 = vmatprep.subr.bf16.mxu1 %v3850_v15  ;;  %v3905_v12 = vcombine.low %v483_v1, %v487_v2  ;;  %v3912_v15 = vcombine.high %v490_v7, %v494_v8  ;;  %v3914_v16 = vcombine.high %v491_v9, %v495_v10  ;;  %v3071_v1 = vld [vmem:[%s5109_s5 + $0x88] sm:$0xff]  ;;  %v3102_v2 = vld [vmem:[%s5109_s5 + $0x180] sm:$0xff] }
 0x1b5   :  { %2882 = vmatprep.mubr.bf16.mxu0 %v4661_v47  ;;  %3011 = vmatprep.mubr.bf16.mxu1 %v4661_v47  ;;  %v3874_v47 = vcombine.high %v451_v31, %v455_v33  ;;  %v518_v31 = vld [vmem:[#allocation8 + $0xb30] sm:$0xff]  ;;  %v515_v33 = vld [vmem:[#allocation8 + $0xb18] sm:$0xff] }
 0x1b7   :  { %2853 = vmatpush1.bf16.msra.mxu0 %v3847_v20  ;;  %2982 = vmatpush1.bf16.msra.mxu1 %v3849_v21  ;;  %v503_v20 = vld [vmem:[#allocation8 + $0xab8] sm:$0xff]  ;;  %v3911_v21 = vcombine.low %v490_v7, %v494_v8  ;;  %v3054_v7 = vld [vmem:[%s5109_s5] sm:$0xff] }
 0x1b8   :  { %2854 = vmatprep.subr.bf16.mxu0 %v3856_v53  ;;  %2983 = vmatprep.subr.bf16.mxu1 %v3858_v23  ;;  %v3913_v53 = vcombine.low %v491_v9, %v495_v10  ;;  %v3920_v23 = vcombine.high %v498_v17, %v502_v18  ;;  %v3922_v63 = vcombine.high %v499_v19, %v503_v20  ;;  %v3055_v8 = vld [vmem:[%s5109_s5 + $0x8] sm:$0xff]  ;;  %v3086_v9 = vld [vmem:[%s5109_s5 + $0x100] sm:$0xff] }
 0x1bb   :  { %2855 = vmatpush1.bf16.msra.mxu0 %v3855_v25  ;;  %2984 = vmatpush1.bf16.msra.mxu1 %v3857_v39  ;;  %v511_v25 = vld [vmem:[#allocation8 + $0xaf8] sm:$0xff]  ;;  %v3919_v39 = vcombine.low %v498_v17, %v502_v18  ;;  %v3105_v17 = vld [vmem:[%s5109_s5 + $0x198] sm:$0xff]  ;;  %v4119_v18 = vpack.c.bf16 %v3055_v8, %v3054_v7 }
 0x1bc   :  { %2856 = vmatprep.subr.bf16.mxu0 %v3864_v26  ;;  %2985 = vmatprep.subr.bf16.mxu1 %v3866_v27  ;;  %v3921_v26 = vcombine.low %v499_v19, %v503_v20  ;;  %v3928_v27 = vcombine.high %v506_v54, %v510_v22  ;;  %v3930_v30 = vcombine.high %v507_v24, %v511_v25 }
 0x1bf   :  { %2857 = vmatpush1.bf16.msra.mxu0 %v3863_v34  ;;  %2986 = vmatpush1.bf16.msra.mxu1 %v3865_v35  ;;  %v519_v34 = vld [vmem:[#allocation8 + $0xb38] sm:$0xff]  ;;  %v3927_v35 = vcombine.low %v506_v54, %v510_v22  ;;  %v3089_v54 = vld [vmem:[%s5109_s5 + $0x118] sm:$0xff]  ;;  %v3074_v22 = vld [vmem:[%s5109_s5 + $0xa0] sm:$0xff] }
 0x1c0   :  { %2858 = vmatprep.subr.bf16.mxu0 %v3872_v36  ;;  %2987 = vmatprep.subr.bf16.mxu1 %v3874_v47  ;;  %v3929_v36 = vcombine.low %v507_v24, %v511_v25  ;;  %v3936_v47 = vcombine.high %v514_v32, %v518_v31  ;;  %v3938_v37 = vcombine.high %v515_v33, %v519_v34  ;;  %v3075_v24 = vld [vmem:[%s5109_s5 + $0xa8] sm:$0xff]  ;;  %v3106_v25 = vld [vmem:[%s5109_s5 + $0x1a0] sm:$0xff] }
 0x1c3   :  { %2859 = vmatpush1.bf16.msra.mxu0 %v3871_v40  ;;  %2988 = vmatpush1.bf16.msra.mxu1 %v3873_v41  ;;  %v527_v40 = vld [vmem:[#allocation8 + $0xb78] sm:$0xff]  ;;  %v3935_v41 = vcombine.low %v514_v32, %v518_v31  ;;  %v3058_v32 = vld [vmem:[%s5109_s5 + $0x20] sm:$0xff] }
 0x1c4   :  { %2860 = vmatprep.subr.bf16.mxu0 %v3880_v42  ;;  %2989 = vmatprep.subr.bf16.mxu1 %v3882_v43  ;;  %v3937_v42 = vcombine.low %v515_v33, %v519_v34  ;;  %v3944_v43 = vcombine.high %v522_v13, %v526_v14  ;;  %v3946_v44 = vcombine.high %v523_v38, %v527_v40  ;;  %v3059_v31 = vld [vmem:[%s5109_s5 + $0x28] sm:$0xff]  ;;  %v3090_v33 = vld [vmem:[%s5109_s5 + $0x120] sm:$0xff] }
 0x1c5   :  { %v3091_v34 = vld [vmem:[%s5109_s5 + $0x128] sm:$0xff] }
 0x1c7   :  { %2861 = vmatpush1.bf16.msra.mxu0 %v3879_v49  ;;  %2990 = vmatpush1.bf16.msra.mxu1 %v3881_v50  ;;  %v535_v49 = vld [vmem:[#allocation8 + $0xbb8] sm:$0xff]  ;;  %v3943_v50 = vcombine.low %v522_v13, %v526_v14  ;;  %v4127_v13 = vpack.c.bf16 %v3059_v31, %v3058_v32  ;;  %v546_v14 = vlaneseq }
 0x1c8   :  { %2862 = vmatprep.subr.bf16.mxu0 %v3888_v51  ;;  %2991 = vmatprep.subr.bf16.mxu1 %v3890_v52  ;;  %v3945_v51 = vcombine.low %v523_v38, %v527_v40  ;;  %v3952_v52 = vcombine.high %v530_v45, %v534_v46  ;;  %v3954_v55 = vcombine.high %v531_v48, %v535_v49  ;;  %v3084_v31 = vld [vmem:[%s5109_s5 + $0xf0] sm:$0xff] }
 0x1c9   :  { %v4159_v38 = vpack.c.bf16 %v3091_v34, %v3090_v33  ;;  %v3085_v33 = vld [vmem:[%s5109_s5 + $0xf8] sm:$0xff] }
 0x1cb   :  { %2863 = vmatpush1.bf16.msra.mxu0 %v3887_v28  ;;  %2992 = vmatpush1.bf16.msra.mxu1 %v3889_v60  ;;  %v543_v28 = vld [vmem:[#allocation8 + $0xbf8] sm:$0xff]  ;;  %v3951_v60 = vcombine.low %v530_v45, %v534_v46  ;;  %v3093_v45 = vld [vmem:[%s5109_s5 + $0x138] sm:$0xff]  ;;  %v3078_v46 = vld [vmem:[%s5109_s5 + $0xc0] sm:$0xff] }
 0x1cc   :  { %2864 = vmatprep.subr.bf16.mxu0 %v3896_v29  ;;  %2993 = vmatprep.subr.bf16.mxu1 %v3898_v61  ;;  %v3953_v29 = vcombine.low %v531_v48, %v535_v49  ;;  %v3960_v61 = vcombine.high %v538_v56, %v542_v57  ;;  %v3962_v62 = vcombine.high %v539_v59, %v543_v28  ;;  %v3079_v48 = vld [vmem:[%s5109_s5 + $0xc8] sm:$0xff]  ;;  %v3110_v49 = vld [vmem:[%s5109_s5 + $0x1c0] sm:$0xff] }
 0x1cf   :  { %2865 = vmatpush1.bf16.msra.mxu0 %v3895_v3  ;;  %2994 = vmatpush1.bf16.msra.mxu1 %v3897_v4  ;;  %v3103_v3 = vld [vmem:[%s5109_s5 + $0x188] sm:$0xff]  ;;  %v3959_v4 = vcombine.low %v538_v56, %v542_v57  ;;  %v4133_v56 = vpack.c.bf16 %v3079_v48, %v3078_v46  ;;  %v3062_v57 = vld [vmem:[%s5109_s5 + $0x40] sm:$0xff]  ;;  %v3069_v46 = vld [vmem:[%s5109_s5 + $0x78] sm:$0xff] }
 0x1d0   :  { %2866 = vmatprep.subr.bf16.mxu0 %v3904_v5  ;;  %2995 = vmatprep.subr.bf16.mxu1 %v3906_v6  ;;  %v3961_v5 = vcombine.low %v539_v59, %v543_v28  ;;  %v4117_v6 = vpack.c.bf16 %v3071_v1, %v3070_v0  ;;  %v4149_v10 = vpack.c.bf16 %v3103_v3, %v3102_v2  ;;  %v3063_v59 = vld [vmem:[%s5109_s5 + $0x48] sm:$0xff]  ;;  %v3094_v28 = vld [vmem:[%s5109_s5 + $0x140] sm:$0xff]  ;;  %v3112_v0 = vld [vmem:[%s5109_s5 + $0x1d0] sm:$0xff] }
 0x1d1   :  { %v3113_v1 = vld [vmem:[%s5109_s5 + $0x1d8] sm:$0xff]  ;;  %v4135_v2 = vpack.c.bf16 %v3063_v59, %v3062_v57  ;;  %v3100_v48 = vld [vmem:[%s5109_s5 + $0x170] sm:$0xff]  ;;  %v3134_v59 = vld [vmem:[%s5109_s5 + $0x280] sm:$0xff] }
 0x1d2   :  { %v4821_v3 = vld [vmem:[#allocation10] sm:$0xff] }
 0x1d3   :  { %2867 = vmatpush1.bf16.msra.mxu0 %v3903_v11  ;;  %2996 = vmatpush1.bf16.msra.mxu1 %v3905_v12  ;;  %v3087_v11 = vld [vmem:[%s5109_s5 + $0x108] sm:$0xff]  ;;  %v3072_v12 = vld [vmem:[%s5109_s5 + $0x90] sm:$0xff] }
 0x1d4   :  { %2868 = vmatprep.subr.bf16.mxu0 %v3912_v15  ;;  %2997 = vmatprep.subr.bf16.mxu1 %v3914_v16  ;;  %v3073_v15 = vld [vmem:[%s5109_s5 + $0x98] sm:$0xff]  ;;  %v3104_v16 = vld [vmem:[%s5109_s5 + $0x190] sm:$0xff]  ;;  %v4151_v19 = vpack.c.bf16 %v3087_v11, %v3086_v9 }
 0x1d5   :  { %v4121_v20 = vpack.c.bf16 %v3073_v15, %v3072_v12  ;;  %v3064_v9 = vld [vmem:[%s5109_s5 + $0x50] sm:$0xff]  ;;  %v4169_v15 = vpack.c.bf16 %v3113_v1, %v3112_v0 }
 0x1d6   :  { %v3096_v11 = vld [vmem:[%s5109_s5 + $0x150] sm:$0xff] }
 0x1d7   :  { %2869 = vmatpush1.bf16.msra.mxu0 %v3911_v21  ;;  %2998 = vmatpush1.bf16.msra.mxu1 %v3913_v53  ;;  %v3056_v21 = vld [vmem:[%s5109_s5 + $0x10] sm:$0xff]  ;;  %v3057_v53 = vld [vmem:[%s5109_s5 + $0x18] sm:$0xff] }
 0x1d8   :  { %2870 = vmatprep.subr.bf16.mxu0 %v3920_v23  ;;  %2999 = vmatprep.subr.bf16.mxu1 %v3922_v63  ;;  %v3088_v23 = vld [vmem:[%s5109_s5 + $0x110] sm:$0xff]  ;;  %v4153_v63 = vpack.c.bf16 %v3105_v17, %v3104_v16  ;;  %v3097_v16 = vld [vmem:[%s5109_s5 + $0x158] sm:$0xff]  ;;  %v3082_v17 = vld [vmem:[%s5109_s5 + $0xe0] sm:$0xff] }
 0x1db   :  { %2871 = vmatpush1.bf16.msra.mxu0 %v3919_v39  ;;  %3000 = vmatpush1.bf16.msra.mxu1 %v3921_v26  ;;  %v3107_v39 = vld [vmem:[%s5109_s5 + $0x1a8] sm:$0xff]  ;;  %v4123_v26 = vpack.c.bf16 %v3057_v53, %v3056_v21 }
 0x1dc   :  { %2872 = vmatprep.subr.bf16.mxu0 %v3928_v27  ;;  %3001 = vmatprep.subr.bf16.mxu1 %v3930_v30  ;;  %v4155_v27 = vpack.c.bf16 %v3089_v54, %v3088_v23  ;;  %v4125_v30 = vpack.c.bf16 %v3075_v24, %v3074_v22  ;;  %v4171_v22 = vpack.c.bf16 %v3097_v16, %v3096_v11  ;;  %v3150_v16 = vld [vmem:[%s5109_s5 + $0x300] sm:$0xff] }
 0x1df   :  { %2873 = vmatpush1.bf16.msra.mxu0 %v3927_v35  ;;  %3002 = vmatpush1.bf16.msra.mxu1 %v3929_v36  ;;  %v3076_v35 = vld [vmem:[%s5109_s5 + $0xb0] sm:$0xff]  ;;  %v3077_v36 = vld [vmem:[%s5109_s5 + $0xb8] sm:$0xff] }
 0x1e0   :  { %2874 = vmatprep.subr.bf16.mxu0 %v3936_v47  ;;  %3003 = vmatprep.subr.bf16.mxu1 %v3938_v37  ;;  %v3108_v47 = vld [vmem:[%s5109_s5 + $0x1b0] sm:$0xff]  ;;  %v3109_v37 = vld [vmem:[%s5109_s5 + $0x1b8] sm:$0xff]  ;;  %v4129_v40 = vpack.c.bf16 %v3077_v36, %v3076_v35 }
 0x1e1   :  { %v3116_v35 = vld [vmem:[%s5109_s5 + $0x1f0] sm:$0xff]  ;;  %v3117_v36 = vld [vmem:[%s5109_s5 + $0x1f8] sm:$0xff] }
 0x1e2   :  { %v4177_v57 = vpack.c.bf16 %v3117_v36, %v3116_v35  ;;  %v3139_v35 = vld [vmem:[%s5109_s5 + $0x2a8] sm:$0xff]  ;;  %v3170_v36 = vld [vmem:[%s5109_s5 + $0x3a0] sm:$0xff] }
 0x1e3   :  { %2875 = vmatpush1.bf16.msra.mxu0 %v3935_v41  ;;  %3004 = vmatpush1.bf16.msra.mxu1 %v3937_v42  ;;  %v3060_v41 = vld [vmem:[%s5109_s5 + $0x30] sm:$0xff]  ;;  %v3061_v42 = vld [vmem:[%s5109_s5 + $0x38] sm:$0xff] }
 0x1e4   :  { %2876 = vmatprep.subr.bf16.mxu0 %v3944_v43  ;;  %3005 = vmatprep.subr.bf16.mxu1 %v3946_v44  ;;  %v3092_v43 = vld [vmem:[%s5109_s5 + $0x130] sm:$0xff]  ;;  %v4161_v44 = vpack.c.bf16 %v3109_v37, %v3108_v47 }
 0x1e7   :  { %2877 = vmatpush1.bf16.msra.mxu0 %v3943_v50  ;;  %3006 = vmatpush1.bf16.msra.mxu1 %v3945_v51  ;;  %v3111_v50 = vld [vmem:[%s5109_s5 + $0x1c8] sm:$0xff]  ;;  %v4131_v51 = vpack.c.bf16 %v3061_v42, %v3060_v41 }
 0x1e8   :  { %2878 = vmatprep.subr.bf16.mxu0 %v3952_v52  ;;  %3007 = vmatprep.subr.bf16.mxu1 %v3954_v55  ;;  %v4795_v52 = vshrl.u32 %v546_v14, 7  ;;  %v4163_v55 = vpack.c.bf16 %v3093_v45, %v3092_v43  ;;  %v4145_v45 = vpack.c.bf16 %v3085_v33, %v3084_v31 }
 0x1ea   :  { %v560_v7 = vsub.s32 3, %v4795_v52  ;;  %v556_v12 = vsub.s32 2, %v4795_v52 }
 0x1eb   :  { %2879 = vmatpush1.bf16.msra.mxu0 %v3951_v60  ;;  %3008 = vmatpush1.bf16.msra.mxu1 %v3953_v29  ;;  %v4165_v60 = vpack.c.bf16 %v3111_v50, %v3110_v49  ;;  %v3095_v29 = vld [vmem:[%s5109_s5 + $0x148] sm:$0xff]  ;;  %v3101_v49 = vld [vmem:[%s5109_s5 + $0x178] sm:$0xff] }
 0x1ec   :  { %2880 = vmatprep.subr.bf16.mxu0 %v3960_v61  ;;  %3009 = vmatprep.subr.bf16.mxu1 %v3962_v62  ;;  %v3080_v61 = vld [vmem:[%s5109_s5 + $0xd0] sm:$0xff]  ;;  %v3081_v62 = vld [vmem:[%s5109_s5 + $0xd8] sm:$0xff]  ;;  %v561_v54 = vrot.slane %v4821_v3, %v560_v7 }
 0x1ed   :  { %v4137_v8 = vpack.c.bf16 %v3081_v62, %v3080_v61  ;;  %v3166_v61 = vld [vmem:[%s5109_s5 + $0x380] sm:$0xff]  ;;  %v3167_v62 = vld [vmem:[%s5109_s5 + $0x388] sm:$0xff] }
 0x1ef   :  { %2881 = vmatpush1.bf16.msra.mxu0 %v3959_v4  ;;  %3010 = vmatpush1.bf16.msra.mxu1 %v3961_v5  ;;  %v548_v4 = vsub.s32 0, %v4795_v52  ;;  %v552_v5 = vsub.s32 1, %v4795_v52 }
 0x1f0   :  { %4118 = vmatprep.subr.bf16.mxu0 %v4117_v6  ;;  %4150 = vmatprep.subr.bf16.mxu1 %v4149_v10  ;;  %v4167_v6 = vpack.c.bf16 %v3095_v29, %v3094_v28  ;;  %v3065_v10 = vld [vmem:[%s5109_s5 + $0x58] sm:$0xff]  ;;  %v3135_v28 = vld [vmem:[%s5109_s5 + $0x288] sm:$0xff] }
 0x1f1   :  { %v549_v21 = vrot.slane %v4821_v3, %v548_v4  ;;  %v553_v53 = vrot.slane %v4821_v3, %v552_v5  ;;  %v4139_v23 = vpack.c.bf16 %v3065_v10, %v3064_v9  ;;  %v4181_v7 = vpack.c.bf16 %v3135_v28, %v3134_v59  ;;  %v3125_v59 = vld [vmem:[%s5109_s5 + $0x238] sm:$0xff]  ;;  %v3156_v28 = vld [vmem:[%s5109_s5 + $0x330] sm:$0xff] }
 0x1f2   :  { %2883 = vmatmul.mubr.bf16.vlgmr.msra.gmra.mrb[4].mxu0 %v4671_v58  ;;  %3012 = vmatmul.mubr.bf16.vlgmr.msra.gmra.mrb[4].mxu1 %v4671_v58  ;;  %v4157_v58 = vpack.c.bf16 %v3107_v39, %v3106_v25  ;;  %v3067_v25 = vld [vmem:[%s5109_s5 + $0x68] sm:$0xff]  ;;  %v3098_v39 = vld [vmem:[%s5109_s5 + $0x160] sm:$0xff] }
 0x1f3   :  { %4120 = vmatpush3.bf16.msra.mxu0 %v4119_v18  ;;  %4152 = vmatpush3.bf16.msra.mxu1 %v4151_v19  ;;  %v3083_v18 = vld [vmem:[%s5109_s5 + $0xe8] sm:$0xff]  ;;  %v3114_v19 = vld [vmem:[%s5109_s5 + $0x1e0] sm:$0xff] }
 0x1f4   :  { %4122 = vmatprep.subr.bf16.mxu0 %v4121_v20  ;;  %4154 = vmatprep.subr.bf16.mxu1 %v4153_v63  ;;  %v3115_v20 = vld [vmem:[%s5109_s5 + $0x1e8] sm:$0xff]  ;;  %v3066_v63 = vld [vmem:[%s5109_s5 + $0x60] sm:$0xff]  ;;  %v4141_v24 = vpack.c.bf16 %v3083_v18, %v3082_v17 }
 0x1f5   :  { %v4173_v32 = vpack.c.bf16 %v3115_v20, %v3114_v19  ;;  %v4143_v14 = vpack.c.bf16 %v3067_v25, %v3066_v63  ;;  %v3151_v17 = vld [vmem:[%s5109_s5 + $0x308] sm:$0xff]  ;;  %v3136_v19 = vld [vmem:[%s5109_s5 + $0x290] sm:$0xff]  ;;  %v3137_v20 = vld [vmem:[%s5109_s5 + $0x298] sm:$0xff] }
 0x1f7   :  { %4124 = vmatpush3.bf16.msra.mxu0 %v4123_v26  ;;  %4156 = vmatpush3.bf16.msra.mxu1 %v4155_v27  ;;  %v3099_v26 = vld [vmem:[%s5109_s5 + $0x168] sm:$0xff] }
 0x1f8   :  { %4126 = vmatprep.subr.bf16.mxu0 %v4125_v30  ;;  %4158 = vmatprep.subr.bf16.mxu1 %v4157_v58  ;;  %v557_v30 = vrot.slane %v4821_v3, %v556_v12  ;;  %v4213_v12 = vpack.c.bf16 %v3167_v62, %v3166_v61  ;;  %v3142_v61 = vld [vmem:[%s5109_s5 + $0x2c0] sm:$0xff]  ;;  %v3143_v62 = vld [vmem:[%s5109_s5 + $0x2c8] sm:$0xff] }
 0x1fb   :  { %4128 = vmatpush3.bf16.msra.mxu0 %v4127_v13  ;;  %4160 = vmatpush3.bf16.msra.mxu1 %v4159_v38  ;;  %v4175_v38 = vpack.c.bf16 %v3099_v26, %v3098_v39  ;;  %v4185_v26 = vpack.c.bf16 %v3137_v20, %v3136_v19  ;;  %v3128_v20 = vld [vmem:[%s5109_s5 + $0x250] sm:$0xff] }
 0x1fc   :  { %4130 = vmatprep.subr.bf16.mxu0 %v4129_v40  ;;  %4162 = vmatprep.subr.bf16.mxu1 %v4161_v44  ;;  %v3068_v40 = vld [vmem:[%s5109_s5 + $0x70] sm:$0xff] }
 0x1fd   :  { %v4147_v1 = vpack.c.bf16 %v3069_v46, %v3068_v40  ;;  %v3140_v46 = vld [vmem:[%s5109_s5 + $0x2b0] sm:$0xff] }
 0x1ff   :  { %4132 = vmatpush3.bf16.msra.mxu0 %v4131_v51  ;;  %4164 = vmatpush3.bf16.msra.mxu1 %v4163_v55 }
 0x200   :  { %4134 = vmatprep.subr.bf16.mxu0 %v4133_v56  ;;  %4166 = vmatprep.subr.bf16.mxu1 %v4165_v60 }
 0x203   :  { %4136 = vmatpush3.bf16.msra.mxu0 %v4135_v2  ;;  %4168 = vmatpush3.bf16.msra.mxu1 %v4167_v6  ;;  %v4179_v2 = vpack.c.bf16 %v3101_v49, %v3100_v48  ;;  %v3141_v48 = vld [vmem:[%s5109_s5 + $0x2b8] sm:$0xff]  ;;  %v3172_v49 = vld [vmem:[%s5109_s5 + $0x3b0] sm:$0xff] }
 0x204   :  { %4138 = vmatprep.subr.bf16.mxu0 %v4137_v8  ;;  %4170 = vmatprep.subr.bf16.mxu1 %v4169_v15  ;;  %v3118_v8 = vld [vmem:[%s5109_s5 + $0x200] sm:$0xff]  ;;  %v3119_v15 = vld [vmem:[%s5109_s5 + $0x208] sm:$0xff] }
 0x205   :  { %v2626_v27 = vpop.f32.mrb[0].mxu0  ;;  %v2755_v58 = vpop.f32.mrb[0].mxu1 }
 0x206   :  { %v2628_v34 = vpop.f32.mrb[1].mxu0  ;;  %v2757_v37 = vpop.f32.mrb[1].mxu1  ;;  %v4245_v41 = vadd.f32 %v2626_v27, %v549_v21  ;;  %v4249_v50 = vadd.f32 %v2755_v58, %v557_v30  ;;  %v3120_v27 = vld [vmem:[%s5109_s5 + $0x210] sm:$0xff]  ;;  %v3153_v58 = vld [vmem:[%s5109_s5 + $0x318] sm:$0xff] }
 0x207   :  { %v4246_v47 = vadd.f32 %v2628_v34, %v553_v53  ;;  %v2630_v13 = vpop.f32.mrb[2].mxu0  ;;  %4140 = vmatpush3.bf16.msra.mxu0 %v4139_v23  ;;  %v4250_v42 = vadd.f32 %v2757_v37, %v561_v54  ;;  %v2759_v43 = vpop.f32.mrb[2].mxu1  ;;  %4172 = vmatpush3.bf16.msra.mxu1 %v4171_v22  ;;  %v4215_v22 = vpack.c.bf16 %v3151_v17, %v3150_v16  ;;  %v3138_v34 = vld [vmem:[%s5109_s5 + $0x2a0] sm:$0xff]  ;;  %v3177_v16 = vld [vmem:[%s5109_s5 + $0x3d8] sm:$0xff] }
 0x208   :  { %v2632_v44 = vpop.f32.mrb[3].mxu0  ;;  %4142 = vmatprep.subr.bf16.mxu0 %v4141_v24  ;;  %v2761_v56 = vpop.f32.mrb[3].mxu1  ;;  %4174 = vmatprep.subr.bf16.mxu1 %v4173_v32  ;;  %v3022_v4 = vmax.f32 %v4245_v41, 0.0  ;;  %v4247_v6 = vadd.f32 %v2630_v13, %v549_v21  ;;  %v3024_v9 = vmax.f32 %v4249_v50, 0.0  ;;  %v4251_v10 = vadd.f32 %v2759_v43, %v557_v30  ;;  %v3168_v21 = vld [vmem:[%s5109_s5 + $0x390] sm:$0xff]  ;;  %v3121_v30 = vld [vmem:[%s5109_s5 + $0x218] sm:$0xff] }
 0x209   :  { %v3023_v51 = vmax.f32 %v4246_v47, 0.0  ;;  %v4248_v55 = vadd.f32 %v2632_v44, %v553_v53  ;;  %v3025_v60 = vmax.f32 %v4250_v42, 0.0  ;;  %v4252_v29 = vadd.f32 %v2761_v56, %v561_v54  ;;  %v3169_v53 = vld [vmem:[%s5109_s5 + $0x398] sm:$0xff]  ;;  %v3152_v32 = vld [vmem:[%s5109_s5 + $0x310] sm:$0xff]  ;;  %v3171_v47 = vld [vmem:[%s5109_s5 + $0x3a8] sm:$0xff] }
 0x20a   :  { %v3038_v23 = vmin.f32 %v3022_v4, 6.0  ;;  %v3030_v63 = vmax.f32 %v4247_v6, 0.0  ;;  %v4183_v54 = vpack.c.bf16 %v3119_v15, %v3118_v8  ;;  %v3040_v24 = vmin.f32 %v3024_v9, 6.0  ;;  %v3122_v41 = vld [vmem:[%s5109_s5 + $0x220] sm:$0xff]  ;;  %v3123_v42 = vld [vmem:[%s5109_s5 + $0x228] sm:$0xff]  ;;  %v3173_v50 = vld [vmem:[%s5109_s5 + $0x3b8] sm:$0xff] }
 0x20b   :  { %v3039_v0 = vmin.f32 %v3023_v51, 6.0  ;;  %4144 = vmatpush3.bf16.msra.mxu0 %v4143_v14  ;;  %v3041_v5 = vmin.f32 %v3025_v60, 6.0  ;;  %4176 = vmatpush3.bf16.msra.mxu1 %v4175_v38  ;;  %v3031_v11 = vmax.f32 %v4248_v55, 0.0  ;;  %v3033_v18 = vmax.f32 %v4252_v29, 0.0  ;;  %v3154_v43 = vld [vmem:[%s5109_s5 + $0x320] sm:$0xff]  ;;  %v3157_v29 = vld [vmem:[%s5109_s5 + $0x338] sm:$0xff] }
 0x20c   :  { %4146 = vmatprep.subr.bf16.mxu0 %v4145_v45  ;;  %4178 = vmatprep.subr.bf16.mxu1 %v4177_v57  ;;  %v3032_v25 = vmax.f32 %v4251_v10, 0.0  ;;  %v4217_v33 = vpack.c.bf16 %v3169_v53, %v3168_v21  ;;  %v3046_v37 = vmin.f32 %v3030_v63, 6.0  ;;  %v4187_v13 = vpack.c.bf16 %v3121_v30, %v3120_v27  ;;  %v3155_v45 = vld [vmem:[%s5109_s5 + $0x328] sm:$0xff]  ;;  %v3124_v57 = vld [vmem:[%s5109_s5 + $0x230] sm:$0xff]  ;;  %v3126_v6 = vld [vmem:[%s5109_s5 + $0x240] sm:$0xff] }
 0x20d   :  { %3246 = vmatprep.mubr.f32.mxu0 %v3039_v0  ;;  %3321 = vmatprep.mubr.f32.mxu1 %v3041_v5  ;;  %v3047_v39 = vmin.f32 %v3031_v11, 6.0  ;;  %v3049_v31 = vmin.f32 %v3033_v18, 6.0  ;;  %v4219_v38 = vpack.c.bf16 %v3153_v58, %v3152_v32  ;;  %v4189_v40 = vpack.c.bf16 %v3139_v35, %v3138_v34  ;;  %v3174_v0 = vld [vmem:[%s5109_s5 + $0x3c0] sm:$0xff]  ;;  %v3159_v10 = vld [vmem:[%s5109_s5 + $0x348] sm:$0xff]  ;;  %v3144_v11 = vld [vmem:[%s5109_s5 + $0x2d0] sm:$0xff] }
 0x20e   :  { %v3048_v14 = vmin.f32 %v3032_v25, 6.0  ;;  %v4221_v44 = vpack.c.bf16 %v3171_v47, %v3170_v36  ;;  %v4191_v51 = vpack.c.bf16 %v3123_v42, %v3122_v41  ;;  %v4223_v55 = vpack.c.bf16 %v3155_v45, %v3154_v43  ;;  %v3158_v8 = vld [vmem:[%s5109_s5 + $0x340] sm:$0xff]  ;;  %v3176_v15 = vld [vmem:[%s5109_s5 + $0x3d0] sm:$0xff]  ;;  %v3129_v21 = vld [vmem:[%s5109_s5 + $0x258] sm:$0xff] }
 0x20f   :  { %4148 = vmatpush3.bf16.msra.mxu0 %v4147_v1  ;;  %4180 = vmatpush3.bf16.msra.mxu1 %v4179_v2  ;;  %v4193_v56 = vpack.c.bf16 %v3141_v48, %v3140_v46  ;;  %v4225_v60 = vpack.c.bf16 %v3173_v50, %v3172_v49  ;;  %v3175_v1 = vld [vmem:[%s5109_s5 + $0x3c8] sm:$0xff]  ;;  %v4195_v2 = vpack.c.bf16 %v3125_v59, %v3124_v57  ;;  %v3161_v63 = vld [vmem:[%s5109_s5 + $0x358] sm:$0xff]  ;;  %v3130_v30 = vld [vmem:[%s5109_s5 + $0x260] sm:$0xff]  ;;  %v564_v46 = vsub.s32 4, %v4795_v52 }
 0x210   :  { %4182 = vmatprep.subr.bf16.mxu0 %v4181_v7  ;;  %4214 = vmatprep.subr.bf16.mxu1 %v4213_v12  ;;  %v4227_v4 = vpack.c.bf16 %v3157_v29, %v3156_v28  ;;  %v4197_v5 = vpack.c.bf16 %v3143_v62, %v3142_v61  ;;  %v3127_v7 = vld [vmem:[%s5109_s5 + $0x248] sm:$0xff]  ;;  %v4229_v9 = vpack.c.bf16 %v3175_v1, %v3174_v0  ;;  %v3145_v12 = vld [vmem:[%s5109_s5 + $0x2d8] sm:$0xff]  ;;  %v3162_v58 = vld [vmem:[%s5109_s5 + $0x360] sm:$0xff]  ;;  %v572_v48 = vsub.s32 6, %v4795_v52 }
 0x211   :  { %v4199_v17 = vpack.c.bf16 %v3127_v7, %v3126_v6  ;;  %v4231_v18 = vpack.c.bf16 %v3159_v10, %v3158_v8  ;;  %v4201_v19 = vpack.c.bf16 %v3145_v12, %v3144_v11  ;;  %v4233_v53 = vpack.c.bf16 %v3177_v16, %v3176_v15  ;;  %v3147_v25 = vld [vmem:[%s5109_s5 + $0x2e8] sm:$0xff]  ;;  %v3148_v36 = vld [vmem:[%s5109_s5 + $0x2f0] sm:$0xff]  ;;  %v3149_v47 = vld [vmem:[%s5109_s5 + $0x2f8] sm:$0xff] }
 0x212   :  { %3247 = vmatmul.mubr.f32.vlgmr.msra.gmra.mrb[8].mxu0 %v3038_v23  ;;  %3322 = vmatmul.mubr.f32.vlgmr.msra.gmra.mrb[8].mxu1 %v3040_v24  ;;  %v3160_v23 = vld [vmem:[%s5109_s5 + $0x350] sm:$0xff]  ;;  %v3146_v24 = vld [vmem:[%s5109_s5 + $0x2e0] sm:$0xff]  ;;  %v3179_v27 = vld [vmem:[%s5109_s5 + $0x3e8] sm:$0xff]  ;;  %v568_v49 = vsub.s32 5, %v4795_v52  ;;  %v576_v50 = vsub.s32 7, %v4795_v52 }
 0x213   :  { %3251 = vmatprep.mubr.f32.mxu0 %v3047_v39  ;;  %3326 = vmatprep.mubr.f32.mxu1 %v3049_v31  ;;  %v3178_v39 = vld [vmem:[%s5109_s5 + $0x3e0] sm:$0xff]  ;;  %v3131_v32 = vld [vmem:[%s5109_s5 + $0x268] sm:$0xff]  ;;  %v3164_v43 = vld [vmem:[%s5109_s5 + $0x370] sm:$0xff] }
 0x214   :  { %4184 = vmatpush3.bf16.msra.mxu0 %v4183_v54  ;;  %4216 = vmatpush3.bf16.msra.mxu1 %v4215_v22  ;;  %v4203_v54 = vpack.c.bf16 %v3129_v21, %v3128_v20  ;;  %v4235_v22 = vpack.c.bf16 %v3161_v63, %v3160_v23  ;;  %v4237_v31 = vpack.c.bf16 %v3179_v27, %v3178_v39  ;;  %v3163_v34 = vld [vmem:[%s5109_s5 + $0x368] sm:$0xff] }
 0x215   :  { %4186 = vmatprep.subr.bf16.mxu0 %v4185_v26  ;;  %4218 = vmatprep.subr.bf16.mxu1 %v4217_v33  ;;  %v4205_v26 = vpack.c.bf16 %v3147_v25, %v3146_v24  ;;  %v4207_v33 = vpack.c.bf16 %v3131_v32, %v3130_v30  ;;  %v4239_v35 = vpack.c.bf16 %v3163_v34, %v3162_v58 }
 0x216   :  { %3252 = vmatmul.mubr.f32.gmra.mrb[10].mxu0 %v3046_v37  ;;  %3327 = vmatmul.mubr.f32.gmra.mrb[10].mxu1 %v3048_v14  ;;  %v3180_v37 = vld [vmem:[%s5109_s5 + $0x3f0] sm:$0xff]  ;;  %v3181_v14 = vld [vmem:[%s5109_s5 + $0x3f8] sm:$0xff]  ;;  %v577_v57 = vrot.slane %v4821_v3, %v576_v50 }
 0x217   :  { %v4241_v41 = vpack.c.bf16 %v3181_v14, %v3180_v37 }
 0x218   :  { %4188 = vmatpush3.bf16.msra.mxu0 %v4187_v13  ;;  %4220 = vmatpush3.bf16.msra.mxu1 %v4219_v38  ;;  %v4209_v13 = vpack.c.bf16 %v3149_v47, %v3148_v36  ;;  %v3132_v38 = vld [vmem:[%s5109_s5 + $0x270] sm:$0xff] }
 0x219   :  { %4190 = vmatprep.subr.bf16.mxu0 %v4189_v40  ;;  %4222 = vmatprep.subr.bf16.mxu1 %v4221_v44  ;;  %v3133_v40 = vld [vmem:[%s5109_s5 + $0x278] sm:$0xff] }
 0x21a   :  { %v4211_v42 = vpack.c.bf16 %v3133_v40, %v3132_v38  ;;  %v3165_v44 = vld [vmem:[%s5109_s5 + $0x378] sm:$0xff]  ;;  %s4488_s5 = smov 120  }
 0x21b   :  { %v4243_v45 = vpack.c.bf16 %v3165_v44, %v3164_v43 }
 0x21c   :  { %4192 = vmatpush3.bf16.msra.mxu0 %v4191_v51  ;;  %4224 = vmatpush3.bf16.msra.mxu1 %v4223_v55  ;;  %v565_v51 = vrot.slane %v4821_v3, %v564_v46  ;;  %v573_v55 = vrot.slane %v4821_v3, %v572_v48 }
 0x21d   :  { %4194 = vmatprep.subr.bf16.mxu0 %v4193_v56  ;;  %4226 = vmatprep.subr.bf16.mxu1 %v4225_v60  ;;  %v569_v56 = vrot.slane %v4821_v3, %v568_v49 }
 0x220   :  { %4196 = vmatpush3.bf16.msra.mxu0 %v4195_v2  ;;  %4228 = vmatpush3.bf16.msra.mxu1 %v4227_v4 }
 0x221   :  { %4198 = vmatprep.subr.bf16.mxu0 %v4197_v5  ;;  %4230 = vmatprep.subr.bf16.mxu1 %v4229_v9 }
 0x224   :  { %4200 = vmatpush3.bf16.msra.mxu0 %v4199_v17  ;;  %4232 = vmatpush3.bf16.msra.mxu1 %v4231_v18 }
 0x225   :  { %4202 = vmatprep.subr.bf16.mxu0 %v4201_v19  ;;  %4234 = vmatprep.subr.bf16.mxu1 %v4233_v53 }
 0x228   :  { %4204 = vmatpush3.bf16.msra.mxu0 %v4203_v54  ;;  %4236 = vmatpush3.bf16.msra.mxu1 %v4235_v22 }
 0x229   :  { %4206 = vmatprep.subr.bf16.mxu0 %v4205_v26  ;;  %4238 = vmatprep.subr.bf16.mxu1 %v4237_v31 }
 0x22c   :  { %4208 = vmatpush3.bf16.msra.mxu0 %v4207_v33  ;;  %4240 = vmatpush3.bf16.msra.mxu1 %v4239_v35 }
 0x22d   :  { %4210 = vmatprep.subr.bf16.mxu0 %v4209_v13  ;;  %4242 = vmatprep.subr.bf16.mxu1 %v4241_v41 }
 0x230   :  { %4212 = vmatpush3.bf16.msra.mxu0 %v4211_v42  ;;  %4244 = vmatpush3.bf16.msra.mxu1 %v4243_v45 }
 0x2c5   :  { %v2884_v59 = vpop.f32.mrb[4].mxu0  ;;  %v3013_v60 = vpop.f32.mrb[4].mxu1 }
 0x2c6   :  { %v4253_v28 = vadd.f32 %v2884_v59, %v565_v51  ;;  %v2886_v29 = vpop.f32.mrb[5].mxu0  ;;  %v4257_v61 = vadd.f32 %v3013_v60, %v573_v55  ;;  %v3015_v0 = vpop.f32.mrb[5].mxu1  ;;  %v3963_v59 = vld [vmem:[#allocation11] ss:$0 sm:$0xff] }
 0x2c7   :  { %v4254_v62 = vadd.f32 %v2886_v29, %v569_v56  ;;  %v2888_v1 = vpop.f32.mrb[6].mxu0  ;;  %v4258_v4 = vadd.f32 %v3015_v0, %v577_v57  ;;  %v3017_v6 = vpop.f32.mrb[6].mxu1  ;;  %v3964_v29 = vld [vmem:[#allocation7] ss:$0 sm:$0xff] }
 0x2c8   :  { %v3026_v2 = vmax.f32 %v4253_v28, 0.0  ;;  %v4255_v5 = vadd.f32 %v2888_v1, %v565_v51  ;;  %v2890_v7 = vpop.f32.mrb[7].mxu0  ;;  %v3028_v8 = vmax.f32 %v4257_v61, 0.0  ;;  %v4259_v10 = vadd.f32 %v3017_v6, %v573_v55  ;;  %v3019_v12 = vpop.f32.mrb[7].mxu1 }
 0x2c9   :  { %v3027_v9 = vmax.f32 %v4254_v62, 0.0  ;;  %v4256_v11 = vadd.f32 %v2890_v7, %v569_v56  ;;  %v3029_v15 = vmax.f32 %v4258_v4, 0.0  ;;  %v4260_v3 = vadd.f32 %v3019_v12, %v577_v57 }
 0x2ca   :  { %v3042_v18 = vmin.f32 %v3026_v2, 6.0  ;;  %v3034_v20 = vmax.f32 %v4255_v5, 0.0  ;;  %v3044_v53 = vmin.f32 %v3028_v8, 6.0  ;;  %v3036_v23 = vmax.f32 %v4259_v10, 0.0 }
 0x2cb   :  { %v3043_v16 = vmin.f32 %v3027_v9, 6.0  ;;  %v3035_v17 = vmax.f32 %v4256_v11, 0.0  ;;  %v3045_v19 = vmin.f32 %v3029_v15, 6.0  ;;  %v3037_v21 = vmax.f32 %v4260_v3, 0.0 }
 0x2cc   :  { %v3050_v22 = vmin.f32 %v3034_v20, 6.0  ;;  %v3052_v24 = vmin.f32 %v3036_v23, 6.0  ;;  %vm3534_vm1 = vcmp.eq.s32.totalorder %v4795_v52, %v3964_v29 }
 0x2cd   :  { %v3051_v63 = vmin.f32 %v3035_v17, 6.0  ;;  %3396 = vmatprep.mubr.f32.mxu0 %v3043_v16  ;;  %v3053_v54 = vmin.f32 %v3037_v21, 6.0  ;;  %3471 = vmatprep.mubr.f32.mxu1 %v3045_v19 }
 0x2ce   :  { %3397 = vmatmul.mubr.f32.vlgmr.msra.gmra.mrb[12].mxu0 %v3042_v18  ;;  %3472 = vmatmul.mubr.f32.vlgmr.msra.gmra.mrb[12].mxu1 %v3044_v53 }
 0x2cf   :  { %3401 = vmatprep.mubr.f32.mxu0 %v3051_v63  ;;  %3476 = vmatprep.mubr.f32.mxu1 %v3053_v54 }
 0x2d2   :  { %3402 = vmatmul.mubr.f32.gmra.mrb[14].mxu0 %v3050_v22  ;;  %3477 = vmatmul.mubr.f32.gmra.mrb[14].mxu1 %v3052_v24 }
 0x2e5   :  { %v3997_v25 = vpop.f32.mrb[8].mxu0  ;;  %v4035_v39 = vpop.f32.mrb[8].mxu1 }
 0x2e6   :  { %v3998_v26 = vpop.f32.mrb[9].mxu0  ;;  %v4036_v30 = vpop.f32.mrb[9].mxu1 }
 0x2e7   :  { %v3999_v27 = vadd.f32 %v3998_v26, %v3997_v25  ;;  %v4037_v32 = vadd.f32 %v4036_v30, %v4035_v39 }
 0x2e9   :  { %v4000_v31 = vpop.f32.mrb[10].mxu0  ;;  %v3324_v33 = vadd.f32 %v4037_v32, %v3999_v27  ;;  %v4038_v58 = vpop.f32.mrb[10].mxu1 }
 0x2ea   :  { %v4001_v34 = vpop.f32.mrb[11].mxu0  ;;  %v4039_v36 = vpop.f32.mrb[11].mxu1 }
 0x2eb   :  { %v4002_v35 = vadd.f32 %v4001_v34, %v4000_v31  ;;  %v4040_v47 = vadd.f32 %v4039_v36, %v4038_v58 }
 0x2ed   :  { %v3329_v37 = vadd.f32 %v4040_v47, %v4002_v35 }
 0x3a1   :  { %v4073_v13 = vpop.f32.mrb[12].mxu0  ;;  %v4111_v14 = vpop.f32.mrb[12].mxu1 }
 0x3a2   :  { %v4074_v38 = vpop.f32.mrb[13].mxu0  ;;  %v4112_v41 = vpop.f32.mrb[13].mxu1 }
 0x3a3   :  { %v4075_v40 = vadd.f32 %v4074_v38, %v4073_v13  ;;  %v4113_v42 = vadd.f32 %v4112_v41, %v4111_v14 }
 0x3a5   :  { %v3399_v43 = vadd.f32 %v4075_v40, %v3324_v33  ;;  %v4076_v44 = vpop.f32.mrb[14].mxu0  ;;  %v4114_v45 = vpop.f32.mrb[14].mxu1 }
 0x3a6   :  { %v4077_v46 = vpop.f32.mrb[15].mxu0  ;;  %v4115_v49 = vpop.f32.mrb[15].mxu1 }
 0x3a7   :  { %v4078_v48 = vadd.f32 %v4077_v46, %v4076_v44  ;;  %v3474_v50 = vadd.f32 %v4113_v42, %v3399_v43  ;;  %v4116_v51 = vadd.f32 %v4115_v49, %v4114_v45 }
 0x3a9   :  { %v3404_v55 = vadd.f32 %v4078_v48, %v3329_v37 }
 0x3ab   :  { %v3479_v56 = vadd.f32 %v4116_v51, %v3404_v55 }
 0x3ad   :  { %3483 = vrot.lane.b32.xlu0 %v3479_v56, %s4488_s5 }
 0x41f   :  { %v3484_v57 = vpop.permute.xlu0 %3483 }
 0x420   :  { %v3486_v28 = vadd.f32 %v3484_v57, %v3474_v50 }
 0x422   :  { %v3494_v60 = vadd.f32 %v3963_v59, %v3486_v28 }
 0x424   :  { %3495 = vxpose.xlu0.b32.start.end [1/1] (short) (narrow) %v3494_v60, 8 }
 0x4a4   :  { %v3511_v61 = vpop.trf.xlu0 }
 0x4a5   :  { %v3535_v62 = vsel %vm3534_vm1, %v3511_v61, 0.0 }
 0x4a6   :  { %v3537_v0 = vsel %vm3536_vm2, %v3535_v62, 0.0 }
 0x4a7   :  { %v3538_v1 = vrot.slane %v3537_v0, 4 }
 0x4a9   :  { %v3539_v2 = vadd.f32 %v3538_v1, %v3537_v0 }
 0x4ab   :  { %v3540_v4 = vrot.slane %v3539_v2, 2 }
 0x4ad   :  { %v3541_v5 = vadd.f32 %v3540_v4, %v3539_v2 }
 0x4af   :  { %v3542_v6 = vrot.slane %v3541_v5, 1 }
 0x4b1   :  { %v3543_v7 = vadd.f32 %v3542_v6, %v3541_v5 }
 0x4b3   :  { %v3545_v8 = vmul.f32 0.0001, %v3543_v7 }
 0x4b5   :  { %v3546_v9 = vfloor.f32 %v3545_v8 }
 0x4b7   :  { %3548 = vst.msk [vmem:[#allocation13] sm:$0x1] %vm3547_vm3, %v3546_v9 }
 0x4b8   :  { %4459 = shalt.err (!%p4456_p10)
}
 0x4b9   :  { %s4460_s23 = scalar_lea.hbm %s5111_s7, 16 }
 0x4ba   :  { %p4461_p11 = scmp.ne.s32.totalorder %s5111_s7, %s4460_s23  ;;  %p4464_p12 = scmp.lt.u32.totalorder %s4460_s23, %s5111_s7 }
 0x4bc   :  { %p4466_p13 = pnand %p4464_p12, %p4461_p11 }
 0x4be   :  { %4469 = shalt.err (!%p4466_p13)
}
 0x4bf   :  { %3558 = dma.vmem_to_hbm [thread:$0]  %s3556_s21, 16, %s5111_s7, [#allocation4]  }
 0x4c0   :  { %4478 = dma.done.wait [#allocation4], 16  }
 0x4c1   :  { %4479 = vsyncadd [#allocation4], 4294967280 }
 0x4c2   :  { %3562 = vsyncpa [#allocation3], 1 }
 0x4c3   :  { %3563 = vsyncpa [#allocation6], 1 }
 0x4c4   :  { %3564 = vsyncpa [#allocation9], 1 }
 0x4c5   :  { %3565 = vsyncpa [#allocation12], 1 }
 0x4c6   :  { %3566 = vsyncpa [#allocation4], 1 }

</bundles_post_ra>
